<compile_context>
chip_gen: v5e
topology: v5e:2x2
jax: 0.10.0
libtpu: 0.0.40
codegen_flags: <defaults>
</compile_context>

<pallas_src>
import jax
import jax.numpy as jnp
from jax import lax
from jax.experimental import pallas as pl
from jax.experimental.pallas import tpu as pltpu


def _round_up(x, m):
    return -(-x // m) * m


# ---------------------------------------------------------------------------
# Fused kernel: all TemporalBlocks + final Linear, one grid step per batch tile
# ---------------------------------------------------------------------------
def _make_fused_tcn_kernel(block_meta, K, L, BT, CP, matmul_dtype):
    # block_meta: tuple of (dilation, has_downsample) per block.
    n_blocks = len(block_meta)
    M = BT * L

    def kernel(x_ref, convw_ref, sqw_ref, bias_ref, o_ref):
        def taps_for(h3, dilation):
            # Causal left zero-pad + K dilated shifts, entirely in registers
            # (this IS the fused Chomp1d: out[:, :, :L] only ever consumes the
            # first L positions of the previous stage).  Shifts are static
            # sublane slices of an f32 value (XLU work), then ONE cast of the
            # whole (M, K*CP) tap slab to the matmul dtype.
            pad = (K - 1) * dilation
            hpad = jnp.concatenate(
                [jnp.zeros((BT, pad, CP), h3.dtype), h3], axis=1)
            taps = [hpad[:, t * dilation:t * dilation + L, :]
                    for t in range(K)]
            return (jnp.concatenate(taps, axis=-1)
                    .reshape(M, K * CP).astype(matmul_dtype))

        def conv_relu(h3, w_idx, b_idx, dilation):
            # One MXU push per conv: (M, K*CP) @ (K*CP, CP), f32 accumulate.
            a = jnp.dot(taps_for(h3, dilation), convw_ref[w_idx],
                        preferred_element_type=jnp.float32)
            return jnp.maximum(a + bias_ref[b_idx:b_idx + 1, :], 0.0)

        h = x_ref[...].astype(jnp.float32)                     # (BT, L, CP)
        for i, (dilation, has_down) in enumerate(block_meta):
            # conv1 + ReLU  (dropout == identity in eval mode)
            o1 = conv_relu(h, 2 * i, 3 * i, dilation)          # (M, CP) f32
            # conv2 + ReLU  (already chomped to length L)
            o2 = conv_relu(o1.reshape(BT, L, CP),
                           2 * i + 1, 3 * i + 1, dilation)     # (M, CP) f32
            if has_down:                                       # 1x1 downsample
                res = jnp.dot(h.reshape(M, CP).astype(matmul_dtype),
                              sqw_ref[i],
                              preferred_element_type=jnp.float32)
                res = res + bias_ref[3 * i + 2:3 * i + 3, :]
            else:                                              # identity res
                res = h.reshape(M, CP)
            h = jnp.maximum(o2 + res, 0.0).reshape(BT, L, CP)  # residual+ReLU

        # Final Linear on the last time step, folded into the same kernel.
        last = h[:, L - 1, :].astype(matmul_dtype)             # (BT, CP)
        y = jnp.dot(last, sqw_ref[n_blocks],
                    preferred_element_type=jnp.float32)
        # Lane-dense output tile: result lives in lane 0, rest is zero.
        o_ref[...] = y + bias_ref[3 * n_blocks:3 * n_blocks + 1, :]

    return kernel


# ---------------------------------------------------------------------------
# Fused forward
# ---------------------------------------------------------------------------
def tcn_forward(x, params, kernel_size, matmul_dtype=jnp.bfloat16,
                block_batch=8):
    # block_batch: batch rows folded into the matmul M axis per grid step
    # (8 -> M=128 suits v5e; 16 -> M=256 suits v6e/v7x).
    B, L, D_in = x.shape
    K = kernel_size
    n_blocks = len(params["blocks"])

    # Common lane-padded channel width (multiple of 128).
    chans = [D_in] + [p["w1"].shape[0] for p in params["blocks"]]
    CP = _round_up(max(chans), 128)

    # ---- pack all weights/biases into 3 lane-aligned slabs ----------------
    convw = jnp.zeros((2 * n_blocks, K * CP, CP), jnp.float32)  # conv1/conv2
    sqw = jnp.zeros((n_blocks + 1, CP, CP), jnp.float32)        # downsample+FC
    bias = jnp.zeros((3 * n_blocks + 1, CP), jnp.float32)       # b1,b2,bd..fc_b
    block_meta = []
    for i, p in enumerate(params["blocks"]):
        c_out = p["w1"].shape[0]
        d = 2 ** i
        for j, (w, b) in enumerate(((p["w1"], p["b1"]), (p["w2"], p["b2"]))):
            ci = w.shape[1]
            wt = jnp.transpose(w, (2, 1, 0))                    # (K, ci, c_out)
            for t in range(K):
                convw = convw.at[2 * i + j,
                                 t * CP:t * CP + ci, :c_out].set(wt[t])
            bias = bias.at[3 * i + j, :c_out].set(b)
        has_down = p["wd"] is not None
        if has_down:
            c_in = p["wd"].shape[1]
            sqw = sqw.at[i, :c_in, :c_out].set(
                jnp.transpose(p["wd"][:, :, 0], (1, 0)))
            bias = bias.at[3 * i + 2, :c_out].set(p["bd"])
        block_meta.append((d, has_down))
    c_last = params["blocks"][-1]["w1"].shape[0]
    sqw = sqw.at[n_blocks, :c_last, 0].set(params["fc_w"][0])
    bias = bias.at[3 * n_blocks, 0].set(params["fc_b"][0])

    convw = convw.astype(matmul_dtype)
    sqw = sqw.astype(matmul_dtype)

    # ---- batch-block into the matmul M axis -------------------------------
    BT = max(1, min(block_batch, B))
    B_pad = _round_up(B, BT)
    xp = jnp.zeros((B_pad, L, CP), jnp.float32).at[:B, :, :D_in].set(
        x.astype(jnp.float32))

    kernel = _make_fused_tcn_kernel(tuple(block_meta), K, L, BT, CP,
                                    matmul_dtype)

    out = pl.pallas_call(
        kernel,
        out_shape=jax.ShapeDtypeStruct((B_pad, CP), jnp.float32),
        grid=(B_pad // BT,),
        in_specs=[
            pl.BlockSpec((BT, L, CP), lambda g: (g, 0, 0)),
            # Weight slabs: constant index_maps -> DMA'd once, VMEM-resident.
            pl.BlockSpec(convw.shape, lambda g: (0, 0, 0)),
            pl.BlockSpec(sqw.shape, lambda g: (0, 0, 0)),
            pl.BlockSpec(bias.shape, lambda g: (0, 0)),
        ],
        out_specs=pl.BlockSpec((BT, CP), lambda g: (g, 0)),
        compiler_params=pltpu.CompilerParams(
            dimension_semantics=("parallel",)),
    )(xp, convw, sqw, bias)
    return out[:B, 0:1]


# ---------------------------------------------------------------------------
# Parameter construction (deterministic, synthetic; torch-like layout)
# ---------------------------------------------------------------------------
def init_params(key, input_dim, num_channels, kernel_size):
    # weight_norm at init has effective weight == v (g = ||v||), so the
    # effective conv weights are used directly.
    blocks = []
    in_c = input_dim
    for out_c in num_channels:
        key, k1, k2, k3, k4, k5, k6 = jax.random.split(key, 7)
        w1 = 0.01 * jax.random.normal(k1, (out_c, in_c, kernel_size), jnp.float32)
        w2 = 0.01 * jax.random.normal(k2, (out_c, out_c, kernel_size), jnp.float32)
        b1 = 0.01 * jax.random.normal(k3, (out_c,), jnp.float32)
        b2 = 0.01 * jax.random.normal(k4, (out_c,), jnp.float32)
        if in_c != out_c:
            wd = 0.01 * jax.random.normal(k5, (out_c, in_c, 1), jnp.float32)
            bd = 0.01 * jax.random.normal(k6, (out_c,), jnp.float32)
        else:
            wd, bd = None, None
        blocks.append(dict(w1=w1, b1=b1, w2=w2, b2=b2, wd=wd, bd=bd))
        in_c = out_c
    key, kf1, kf2 = jax.random.split(key, 3)
    fc_w = 0.01 * jax.random.normal(kf1, (1, num_channels[-1]), jnp.float32)
    fc_b = 0.01 * jax.random.normal(kf2, (1,), jnp.float32)
    return dict(blocks=blocks, fc_w=fc_w, fc_b=fc_b)


# ---------------------------------------------------------------------------
# Pure-JAX reference (lax.conv_general_dilated) for validation
# ---------------------------------------------------------------------------
def tcn_reference(x, params, kernel_size):
    h = jnp.transpose(x.astype(jnp.float32), (0, 2, 1))        # NCL
    for i, p in enumerate(params["blocks"]):
        d = 2 ** i
        pad = (kernel_size - 1) * d
        out = lax.conv_general_dilated(h, p["w1"], (1,), [(pad, pad)],
                                       rhs_dilation=(d,),
                                       dimension_numbers=("NCH", "OIH", "NCH"))
        out = jax.nn.relu(out + p["b1"][None, :, None])
        out = lax.conv_general_dilated(out, p["w2"], (1,), [(pad, pad)],
                                       rhs_dilation=(d,),
                                       dimension_numbers=("NCH", "OIH", "NCH"))
        out = jax.nn.relu(out + p["b2"][None, :, None])
        if p["wd"] is not None:
            res = lax.conv_general_dilated(h, p["wd"], (1,), [(0, 0)],
                                           dimension_numbers=("NCH", "OIH", "NCH"))
            res = res + p["bd"][None, :, None]
        else:
            res = h
        out = out[:, :, :res.shape[2]]
        h = jax.nn.relu(out + res)
    last = h[:, :, -1]
    return last @ params["fc_w"].T + params["fc_b"]


# ---------------------------------------------------------------------------
if __name__ == "__main__":
    input_dim = 4
    num_channels = [32, 64, 128]
    kernel_size = 3
    B, L = 2, 16

    key = jax.random.PRNGKey(0)
    key, kx = jax.random.split(key)
    x = jax.random.normal(kx, (B, L, input_dim), jnp.float32)
    params = init_params(key, input_dim, num_channels, kernel_size)

    ref = jax.block_until_ready(tcn_reference(x, params, kernel_size))

    fwd = jax.jit(tcn_forward,
                  static_argnames=("kernel_size", "matmul_dtype", "block_batch"))

    # f32 matmul operands: tight check against the XLA conv reference.
    out_f32 = jax.block_until_ready(
        fwd(x, params, kernel_size=kernel_size, matmul_dtype=jnp.float32))
    assert out_f32.shape == (B, 1), out_f32.shape
    assert jnp.allclose(out_f32, ref, atol=1e-5, rtol=1e-5), (out_f32, ref)

    # Default bf16 matmul operands (MXU-native on v5e/v6e/v7x), f32 epilogue.
    out_bf16 = jax.block_until_ready(fwd(x, params, kernel_size=kernel_size))
    assert jnp.allclose(out_bf16, ref, atol=3e-3, rtol=5e-2), (out_bf16, ref)

    # Exercise the identity-residual path (a block with n_in == n_out).
    params2 = init_params(jax.random.PRNGKey(1), input_dim, [32, 32, 64],
                          kernel_size)
    ref2 = jax.block_until_ready(tcn_reference(x, params2, kernel_size))
    out2 = jax.block_until_ready(
        fwd(x, params2, kernel_size=kernel_size, matmul_dtype=jnp.float32))
    assert jnp.allclose(out2, ref2, atol=1e-5, rtol=1e-5), (out2, ref2)

    print("KERNEL_OK")
</pallas_src>

<mosaic_0001>
module attributes {stable_mosaic.version = 11 : i64} {
  func.func @kernel(%arg0: i32, %arg1: memref<2x16x128xf32, #tpu.memory_space<vmem>>, %arg2: memref<6x384x128xf32, #tpu.memory_space<vmem>>, %arg3: memref<4x128x128xf32, #tpu.memory_space<vmem>>, %arg4: memref<10x128xf32, #tpu.memory_space<vmem>>, %arg5: memref<2x128xf32, #tpu.memory_space<vmem>>) attributes {dimension_semantics = [#tpu.dimension_semantics<parallel>], iteration_bounds = array<i64: 1>, scalar_prefetch = 0 : i64, scratch_operands = 0 : i64, tpu.core_type = #tpu.core_type<tc>, window_params = [{transform_indices = @transform_0, window_bounds = array<i64: 2, 16, 128>}, {pipeline_mode = #tpu.pipeline_mode<synchronous>, transform_indices = @transform_1, window_bounds = array<i64: 6, 384, 128>}, {pipeline_mode = #tpu.pipeline_mode<synchronous>, transform_indices = @transform_2, window_bounds = array<i64: 4, 128, 128>}, {pipeline_mode = #tpu.pipeline_mode<synchronous>, transform_indices = @transform_3, window_bounds = array<i64: 10, 128>}, {transform_indices = @transform_4, window_bounds = array<i64: 2, 128>}]} {
    %c0 = arith.constant 0 : index
    %c0_0 = arith.constant 0 : index
    %c0_1 = arith.constant 0 : index
    %0 = vector.load %arg1[%c0, %c0_0, %c0_1] : memref<2x16x128xf32, #tpu.memory_space<vmem>>, vector<2x16x128xf32>
    %cst = arith.constant 0.000000e+00 : f32
    %1 = vector.broadcast %cst : f32 to vector<2x2x128xf32>
    %2 = tpu.concatenate %1, %0 in 1 : vector<2x2x128xf32>, vector<2x16x128xf32> -> vector<2x18x128xf32>
    %3 = vector.extract_strided_slice %2 {offsets = [0, 0, 0], sizes = [2, 16, 128], strides = [1, 1, 1]} : vector<2x18x128xf32> to vector<2x16x128xf32>
    %4 = vector.extract_strided_slice %2 {offsets = [0, 1, 0], sizes = [2, 16, 128], strides = [1, 1, 1]} : vector<2x18x128xf32> to vector<2x16x128xf32>
    %5 = vector.extract_strided_slice %2 {offsets = [0, 2, 0], sizes = [2, 16, 128], strides = [1, 1, 1]} : vector<2x18x128xf32> to vector<2x16x128xf32>
    %6 = tpu.concatenate %3, %4, %5 in 2 : vector<2x16x128xf32>, vector<2x16x128xf32>, vector<2x16x128xf32> -> vector<2x16x384xf32>
    %7 = vector.shape_cast %6 : vector<2x16x384xf32> to vector<32x384xf32>
    %c0_2 = arith.constant 0 : index
    %c0_3 = arith.constant 0 : index
    %c0_4 = arith.constant 0 : index
    %8 = vector.load %arg2[%c0_2, %c0_3, %c0_4] : memref<6x384x128xf32, #tpu.memory_space<vmem>>, vector<1x384x128xf32>
    %9 = vector.shape_cast %8 : vector<1x384x128xf32> to vector<384x128xf32>
    %cst_5 = arith.constant dense<0.000000e+00> : vector<32x128xf32>
    %10 = tpu.matmul %7, %9, %cst_5 {dimension_numbers = #tpu.dot_dimension_numbers<[1], [0], [0], [1], [0, 0, 1, 1], [], []>} : vector<32x384xf32>, vector<384x128xf32>, vector<32x128xf32> -> vector<32x128xf32>
    %c0_6 = arith.constant 0 : index
    %c0_7 = arith.constant 0 : index
    %11 = vector.load %arg4[%c0_6, %c0_7] : memref<10x128xf32, #tpu.memory_space<vmem>>, vector<1x128xf32>
    %12 = vector.broadcast %11 : vector<1x128xf32> to vector<32x128xf32>
    %13 = arith.addf %10, %12 : vector<32x128xf32>
    %cst_8 = arith.constant 0.000000e+00 : f32
    %14 = vector.broadcast %cst_8 : f32 to vector<32x128xf32>
    %15 = arith.maximumf %13, %14 : vector<32x128xf32>
    %16 = vector.shape_cast %15 : vector<32x128xf32> to vector<2x16x128xf32>
    %cst_9 = arith.constant 0.000000e+00 : f32
    %17 = vector.broadcast %cst_9 : f32 to vector<2x2x128xf32>
    %18 = tpu.concatenate %17, %16 in 1 : vector<2x2x128xf32>, vector<2x16x128xf32> -> vector<2x18x128xf32>
    %19 = vector.extract_strided_slice %18 {offsets = [0, 0, 0], sizes = [2, 16, 128], strides = [1, 1, 1]} : vector<2x18x128xf32> to vector<2x16x128xf32>
    %20 = vector.extract_strided_slice %18 {offsets = [0, 1, 0], sizes = [2, 16, 128], strides = [1, 1, 1]} : vector<2x18x128xf32> to vector<2x16x128xf32>
    %21 = vector.extract_strided_slice %18 {offsets = [0, 2, 0], sizes = [2, 16, 128], strides = [1, 1, 1]} : vector<2x18x128xf32> to vector<2x16x128xf32>
    %22 = tpu.concatenate %19, %20, %21 in 2 : vector<2x16x128xf32>, vector<2x16x128xf32>, vector<2x16x128xf32> -> vector<2x16x384xf32>
    %23 = vector.shape_cast %22 : vector<2x16x384xf32> to vector<32x384xf32>
    %c1 = arith.constant 1 : index
    %c0_10 = arith.constant 0 : index
    %c0_11 = arith.constant 0 : index
    %24 = vector.load %arg2[%c1, %c0_10, %c0_11] : memref<6x384x128xf32, #tpu.memory_space<vmem>>, vector<1x384x128xf32>
    %25 = vector.shape_cast %24 : vector<1x384x128xf32> to vector<384x128xf32>
    %cst_12 = arith.constant dense<0.000000e+00> : vector<32x128xf32>
    %26 = tpu.matmul %23, %25, %cst_12 {dimension_numbers = #tpu.dot_dimension_numbers<[1], [0], [0], [1], [0, 0, 1, 1], [], []>} : vector<32x384xf32>, vector<384x128xf32>, vector<32x128xf32> -> vector<32x128xf32>
    %c1_13 = arith.constant 1 : index
    %c0_14 = arith.constant 0 : index
    %27 = vector.load %arg4[%c1_13, %c0_14] : memref<10x128xf32, #tpu.memory_space<vmem>>, vector<1x128xf32>
    %28 = vector.broadcast %27 : vector<1x128xf32> to vector<32x128xf32>
    %29 = arith.addf %26, %28 : vector<32x128xf32>
    %cst_15 = arith.constant 0.000000e+00 : f32
    %30 = vector.broadcast %cst_15 : f32 to vector<32x128xf32>
    %31 = arith.maximumf %29, %30 : vector<32x128xf32>
    %32 = vector.shape_cast %0 : vector<2x16x128xf32> to vector<32x128xf32>
    %c0_16 = arith.constant 0 : index
    %c0_17 = arith.constant 0 : index
    %c0_18 = arith.constant 0 : index
    %33 = vector.load %arg3[%c0_16, %c0_17, %c0_18] : memref<4x128x128xf32, #tpu.memory_space<vmem>>, vector<1x128x128xf32>
    %34 = vector.shape_cast %33 : vector<1x128x128xf32> to vector<128x128xf32>
    %cst_19 = arith.constant dense<0.000000e+00> : vector<32x128xf32>
    %35 = tpu.matmul %32, %34, %cst_19 {dimension_numbers = #tpu.dot_dimension_numbers<[1], [0], [0], [1], [0, 0, 1, 1], [], []>} : vector<32x128xf32>, vector<128x128xf32>, vector<32x128xf32> -> vector<32x128xf32>
    %c2 = arith.constant 2 : index
    %c0_20 = arith.constant 0 : index
    %36 = vector.load %arg4[%c2, %c0_20] : memref<10x128xf32, #tpu.memory_space<vmem>>, vector<1x128xf32>
    %37 = vector.broadcast %36 : vector<1x128xf32> to vector<32x128xf32>
    %38 = arith.addf %35, %37 : vector<32x128xf32>
    %39 = arith.addf %31, %38 : vector<32x128xf32>
    %cst_21 = arith.constant 0.000000e+00 : f32
    %40 = vector.broadcast %cst_21 : f32 to vector<32x128xf32>
    %41 = arith.maximumf %39, %40 : vector<32x128xf32>
    %42 = vector.shape_cast %41 : vector<32x128xf32> to vector<2x16x128xf32>
    %cst_22 = arith.constant 0.000000e+00 : f32
    %43 = vector.broadcast %cst_22 : f32 to vector<2x4x128xf32>
    %44 = tpu.concatenate %43, %42 in 1 : vector<2x4x128xf32>, vector<2x16x128xf32> -> vector<2x20x128xf32>
    %45 = vector.extract_strided_slice %44 {offsets = [0, 0, 0], sizes = [2, 16, 128], strides = [1, 1, 1]} : vector<2x20x128xf32> to vector<2x16x128xf32>
    %46 = vector.extract_strided_slice %44 {offsets = [0, 2, 0], sizes = [2, 16, 128], strides = [1, 1, 1]} : vector<2x20x128xf32> to vector<2x16x128xf32>
    %47 = vector.extract_strided_slice %44 {offsets = [0, 4, 0], sizes = [2, 16, 128], strides = [1, 1, 1]} : vector<2x20x128xf32> to vector<2x16x128xf32>
    %48 = tpu.concatenate %45, %46, %47 in 2 : vector<2x16x128xf32>, vector<2x16x128xf32>, vector<2x16x128xf32> -> vector<2x16x384xf32>
    %49 = vector.shape_cast %48 : vector<2x16x384xf32> to vector<32x384xf32>
    %c2_23 = arith.constant 2 : index
    %c0_24 = arith.constant 0 : index
    %c0_25 = arith.constant 0 : index
    %50 = vector.load %arg2[%c2_23, %c0_24, %c0_25] : memref<6x384x128xf32, #tpu.memory_space<vmem>>, vector<1x384x128xf32>
    %51 = vector.shape_cast %50 : vector<1x384x128xf32> to vector<384x128xf32>
    %cst_26 = arith.constant dense<0.000000e+00> : vector<32x128xf32>
    %52 = tpu.matmul %49, %51, %cst_26 {dimension_numbers = #tpu.dot_dimension_numbers<[1], [0], [0], [1], [0, 0, 1, 1], [], []>} : vector<32x384xf32>, vector<384x128xf32>, vector<32x128xf32> -> vector<32x128xf32>
    %c3 = arith.constant 3 : index
    %c0_27 = arith.constant 0 : index
    %53 = vector.load %arg4[%c3, %c0_27] : memref<10x128xf32, #tpu.memory_space<vmem>>, vector<1x128xf32>
    %54 = vector.broadcast %53 : vector<1x128xf32> to vector<32x128xf32>
    %55 = arith.addf %52, %54 : vector<32x128xf32>
    %cst_28 = arith.constant 0.000000e+00 : f32
    %56 = vector.broadcast %cst_28 : f32 to vector<32x128xf32>
    %57 = arith.maximumf %55, %56 : vector<32x128xf32>
    %58 = vector.shape_cast %57 : vector<32x128xf32> to vector<2x16x128xf32>
    %cst_29 = arith.constant 0.000000e+00 : f32
    %59 = vector.broadcast %cst_29 : f32 to vector<2x4x128xf32>
    %60 = tpu.concatenate %59, %58 in 1 : vector<2x4x128xf32>, vector<2x16x128xf32> -> vector<2x20x128xf32>
    %61 = vector.extract_strided_slice %60 {offsets = [0, 0, 0], sizes = [2, 16, 128], strides = [1, 1, 1]} : vector<2x20x128xf32> to vector<2x16x128xf32>
    %62 = vector.extract_strided_slice %60 {offsets = [0, 2, 0], sizes = [2, 16, 128], strides = [1, 1, 1]} : vector<2x20x128xf32> to vector<2x16x128xf32>
    %63 = vector.extract_strided_slice %60 {offsets = [0, 4, 0], sizes = [2, 16, 128], strides = [1, 1, 1]} : vector<2x20x128xf32> to vector<2x16x128xf32>
    %64 = tpu.concatenate %61, %62, %63 in 2 : vector<2x16x128xf32>, vector<2x16x128xf32>, vector<2x16x128xf32> -> vector<2x16x384xf32>
    %65 = vector.shape_cast %64 : vector<2x16x384xf32> to vector<32x384xf32>
    %c3_30 = arith.constant 3 : index
    %c0_31 = arith.constant 0 : index
    %c0_32 = arith.constant 0 : index
    %66 = vector.load %arg2[%c3_30, %c0_31, %c0_32] : memref<6x384x128xf32, #tpu.memory_space<vmem>>, vector<1x384x128xf32>
    %67 = vector.shape_cast %66 : vector<1x384x128xf32> to vector<384x128xf32>
    %cst_33 = arith.constant dense<0.000000e+00> : vector<32x128xf32>
    %68 = tpu.matmul %65, %67, %cst_33 {dimension_numbers = #tpu.dot_dimension_numbers<[1], [0], [0], [1], [0, 0, 1, 1], [], []>} : vector<32x384xf32>, vector<384x128xf32>, vector<32x128xf32> -> vector<32x128xf32>
    %c4 = arith.constant 4 : index
    %c0_34 = arith.constant 0 : index
    %69 = vector.load %arg4[%c4, %c0_34] : memref<10x128xf32, #tpu.memory_space<vmem>>, vector<1x128xf32>
    %70 = vector.broadcast %69 : vector<1x128xf32> to vector<32x128xf32>
    %71 = arith.addf %68, %70 : vector<32x128xf32>
    %cst_35 = arith.constant 0.000000e+00 : f32
    %72 = vector.broadcast %cst_35 : f32 to vector<32x128xf32>
    %73 = arith.maximumf %71, %72 : vector<32x128xf32>
    %74 = vector.shape_cast %42 : vector<2x16x128xf32> to vector<32x128xf32>
    %c1_36 = arith.constant 1 : index
    %c0_37 = arith.constant 0 : index
    %c0_38 = arith.constant 0 : index
    %75 = vector.load %arg3[%c1_36, %c0_37, %c0_38] : memref<4x128x128xf32, #tpu.memory_space<vmem>>, vector<1x128x128xf32>
    %76 = vector.shape_cast %75 : vector<1x128x128xf32> to vector<128x128xf32>
    %cst_39 = arith.constant dense<0.000000e+00> : vector<32x128xf32>
    %77 = tpu.matmul %74, %76, %cst_39 {dimension_numbers = #tpu.dot_dimension_numbers<[1], [0], [0], [1], [0, 0, 1, 1], [], []>} : vector<32x128xf32>, vector<128x128xf32>, vector<32x128xf32> -> vector<32x128xf32>
    %c5 = arith.constant 5 : index
    %c0_40 = arith.constant 0 : index
    %78 = vector.load %arg4[%c5, %c0_40] : memref<10x128xf32, #tpu.memory_space<vmem>>, vector<1x128xf32>
    %79 = vector.broadcast %78 : vector<1x128xf32> to vector<32x128xf32>
    %80 = arith.addf %77, %79 : vector<32x128xf32>
    %81 = arith.addf %73, %80 : vector<32x128xf32>
    %cst_41 = arith.constant 0.000000e+00 : f32
    %82 = vector.broadcast %cst_41 : f32 to vector<32x128xf32>
    %83 = arith.maximumf %81, %82 : vector<32x128xf32>
    %84 = vector.shape_cast %83 : vector<32x128xf32> to vector<2x16x128xf32>
    %cst_42 = arith.constant 0.000000e+00 : f32
    %85 = vector.broadcast %cst_42 : f32 to vector<2x8x128xf32>
    %86 = tpu.concatenate %85, %84 in 1 : vector<2x8x128xf32>, vector<2x16x128xf32> -> vector<2x24x128xf32>
    %87 = vector.extract_strided_slice %86 {offsets = [0, 0, 0], sizes = [2, 16, 128], strides = [1, 1, 1]} : vector<2x24x128xf32> to vector<2x16x128xf32>
    %88 = vector.extract_strided_slice %86 {offsets = [0, 4, 0], sizes = [2, 16, 128], strides = [1, 1, 1]} : vector<2x24x128xf32> to vector<2x16x128xf32>
    %89 = vector.extract_strided_slice %86 {offsets = [0, 8, 0], sizes = [2, 16, 128], strides = [1, 1, 1]} : vector<2x24x128xf32> to vector<2x16x128xf32>
    %90 = tpu.concatenate %87, %88, %89 in 2 : vector<2x16x128xf32>, vector<2x16x128xf32>, vector<2x16x128xf32> -> vector<2x16x384xf32>
    %91 = vector.shape_cast %90 : vector<2x16x384xf32> to vector<32x384xf32>
    %c4_43 = arith.constant 4 : index
    %c0_44 = arith.constant 0 : index
    %c0_45 = arith.constant 0 : index
    %92 = vector.load %arg2[%c4_43, %c0_44, %c0_45] : memref<6x384x128xf32, #tpu.memory_space<vmem>>, vector<1x384x128xf32>
    %93 = vector.shape_cast %92 : vector<1x384x128xf32> to vector<384x128xf32>
    %cst_46 = arith.constant dense<0.000000e+00> : vector<32x128xf32>
    %94 = tpu.matmul %91, %93, %cst_46 {dimension_numbers = #tpu.dot_dimension_numbers<[1], [0], [0], [1], [0, 0, 1, 1], [], []>} : vector<32x384xf32>, vector<384x128xf32>, vector<32x128xf32> -> vector<32x128xf32>
    %c6 = arith.constant 6 : index
    %c0_47 = arith.constant 0 : index
    %95 = vector.load %arg4[%c6, %c0_47] : memref<10x128xf32, #tpu.memory_space<vmem>>, vector<1x128xf32>
    %96 = vector.broadcast %95 : vector<1x128xf32> to vector<32x128xf32>
    %97 = arith.addf %94, %96 : vector<32x128xf32>
    %cst_48 = arith.constant 0.000000e+00 : f32
    %98 = vector.broadcast %cst_48 : f32 to vector<32x128xf32>
    %99 = arith.maximumf %97, %98 : vector<32x128xf32>
    %100 = vector.shape_cast %99 : vector<32x128xf32> to vector<2x16x128xf32>
    %cst_49 = arith.constant 0.000000e+00 : f32
    %101 = vector.broadcast %cst_49 : f32 to vector<2x8x128xf32>
    %102 = tpu.concatenate %101, %100 in 1 : vector<2x8x128xf32>, vector<2x16x128xf32> -> vector<2x24x128xf32>
    %103 = vector.extract_strided_slice %102 {offsets = [0, 0, 0], sizes = [2, 16, 128], strides = [1, 1, 1]} : vector<2x24x128xf32> to vector<2x16x128xf32>
    %104 = vector.extract_strided_slice %102 {offsets = [0, 4, 0], sizes = [2, 16, 128], strides = [1, 1, 1]} : vector<2x24x128xf32> to vector<2x16x128xf32>
    %105 = vector.extract_strided_slice %102 {offsets = [0, 8, 0], sizes = [2, 16, 128], strides = [1, 1, 1]} : vector<2x24x128xf32> to vector<2x16x128xf32>
    %106 = tpu.concatenate %103, %104, %105 in 2 : vector<2x16x128xf32>, vector<2x16x128xf32>, vector<2x16x128xf32> -> vector<2x16x384xf32>
    %107 = vector.shape_cast %106 : vector<2x16x384xf32> to vector<32x384xf32>
    %c5_50 = arith.constant 5 : index
    %c0_51 = arith.constant 0 : index
    %c0_52 = arith.constant 0 : index
    %108 = vector.load %arg2[%c5_50, %c0_51, %c0_52] : memref<6x384x128xf32, #tpu.memory_space<vmem>>, vector<1x384x128xf32>
    %109 = vector.shape_cast %108 : vector<1x384x128xf32> to vector<384x128xf32>
    %cst_53 = arith.constant dense<0.000000e+00> : vector<32x128xf32>
    %110 = tpu.matmul %107, %109, %cst_53 {dimension_numbers = #tpu.dot_dimension_numbers<[1], [0], [0], [1], [0, 0, 1, 1], [], []>} : vector<32x384xf32>, vector<384x128xf32>, vector<32x128xf32> -> vector<32x128xf32>
    %c7 = arith.constant 7 : index
    %c0_54 = arith.constant 0 : index
    %111 = vector.load %arg4[%c7, %c0_54] : memref<10x128xf32, #tpu.memory_space<vmem>>, vector<1x128xf32>
    %112 = vector.broadcast %111 : vector<1x128xf32> to vector<32x128xf32>
    %113 = arith.addf %110, %112 : vector<32x128xf32>
    %cst_55 = arith.constant 0.000000e+00 : f32
    %114 = vector.broadcast %cst_55 : f32 to vector<32x128xf32>
    %115 = arith.maximumf %113, %114 : vector<32x128xf32>
    %116 = vector.shape_cast %84 : vector<2x16x128xf32> to vector<32x128xf32>
    %c2_56 = arith.constant 2 : index
    %c0_57 = arith.constant 0 : index
    %c0_58 = arith.constant 0 : index
    %117 = vector.load %arg3[%c2_56, %c0_57, %c0_58] : memref<4x128x128xf32, #tpu.memory_space<vmem>>, vector<1x128x128xf32>
    %118 = vector.shape_cast %117 : vector<1x128x128xf32> to vector<128x128xf32>
    %cst_59 = arith.constant dense<0.000000e+00> : vector<32x128xf32>
    %119 = tpu.matmul %116, %118, %cst_59 {dimension_numbers = #tpu.dot_dimension_numbers<[1], [0], [0], [1], [0, 0, 1, 1], [], []>} : vector<32x128xf32>, vector<128x128xf32>, vector<32x128xf32> -> vector<32x128xf32>
    %c8 = arith.constant 8 : index
    %c0_60 = arith.constant 0 : index
    %120 = vector.load %arg4[%c8, %c0_60] : memref<10x128xf32, #tpu.memory_space<vmem>>, vector<1x128xf32>
    %121 = vector.broadcast %120 : vector<1x128xf32> to vector<32x128xf32>
    %122 = arith.addf %119, %121 : vector<32x128xf32>
    %123 = arith.addf %115, %122 : vector<32x128xf32>
    %cst_61 = arith.constant 0.000000e+00 : f32
    %124 = vector.broadcast %cst_61 : f32 to vector<32x128xf32>
    %125 = arith.maximumf %123, %124 : vector<32x128xf32>
    %126 = vector.shape_cast %125 : vector<32x128xf32> to vector<2x16x128xf32>
    %127 = vector.extract_strided_slice %126 {offsets = [0, 15, 0], sizes = [2, 1, 128], strides = [1, 1, 1]} : vector<2x16x128xf32> to vector<2x1x128xf32>
    %128 = vector.shape_cast %127 : vector<2x1x128xf32> to vector<2x128xf32>
    %c3_62 = arith.constant 3 : index
    %c0_63 = arith.constant 0 : index
    %c0_64 = arith.constant 0 : index
    %129 = vector.load %arg3[%c3_62, %c0_63, %c0_64] : memref<4x128x128xf32, #tpu.memory_space<vmem>>, vector<1x128x128xf32>
    %130 = vector.shape_cast %129 : vector<1x128x128xf32> to vector<128x128xf32>
    %cst_65 = arith.constant dense<0.000000e+00> : vector<2x128xf32>
    %131 = tpu.matmul %128, %130, %cst_65 {dimension_numbers = #tpu.dot_dimension_numbers<[1], [0], [0], [1], [0, 0, 1, 1], [], []>} : vector<2x128xf32>, vector<128x128xf32>, vector<2x128xf32> -> vector<2x128xf32>
    %c9 = arith.constant 9 : index
    %c0_66 = arith.constant 0 : index
    %132 = vector.load %arg4[%c9, %c0_66] : memref<10x128xf32, #tpu.memory_space<vmem>>, vector<1x128xf32>
    %133 = vector.broadcast %132 : vector<1x128xf32> to vector<2x128xf32>
    %134 = arith.addf %131, %133 : vector<2x128xf32>
    %c0_67 = arith.constant 0 : index
    %c0_68 = arith.constant 0 : index
    %135 = vector.load %arg5[%c0_67, %c0_68] : memref<2x128xf32, #tpu.memory_space<vmem>>, vector<2x128xf32>
    tpu.vector_store %arg5[%c0_67, %c0_68], %134 {strides = array<i32>} : memref<2x128xf32, #tpu.memory_space<vmem>>, vector<2x128xf32>,
    return
  }
  func.func @transform_0(%arg0: i32) -> (i32, i32, i32) {
    %c0_i32 = arith.constant 0 : i32
    %c0_i32_0 = arith.constant 0 : i32
    %c0_i32_1 = arith.constant 0 : i32
    return %arg0, %c0_i32, %c0_i32_0 : i32, i32, i32
  }
  func.func @transform_1(%arg0: i32) -> (i32, i32, i32) {
    %c0_i32 = arith.constant 0 : i32
    %c0_i32_0 = arith.constant 0 : i32
    %c0_i32_1 = arith.constant 0 : i32
    %c0_i32_2 = arith.constant 0 : i32
    return %c0_i32, %c0_i32_0, %c0_i32_1 : i32, i32, i32
  }
  func.func @transform_2(%arg0: i32) -> (i32, i32, i32) {
    %c0_i32 = arith.constant 0 : i32
    %c0_i32_0 = arith.constant 0 : i32
    %c0_i32_1 = arith.constant 0 : i32
    %c0_i32_2 = arith.constant 0 : i32
    return %c0_i32, %c0_i32_0, %c0_i32_1 : i32, i32, i32
  }
  func.func @transform_3(%arg0: i32) -> (i32, i32) {
    %c0_i32 = arith.constant 0 : i32
    %c0_i32_0 = arith.constant 0 : i32
    %c0_i32_1 = arith.constant 0 : i32
    return %c0_i32, %c0_i32_0 : i32, i32
  }
  func.func @transform_4(%arg0: i32) -> (i32, i32) {
    %c0_i32 = arith.constant 0 : i32
    %c0_i32_0 = arith.constant 0 : i32
    return %arg0, %c0_i32 : i32, i32
  }
}

</mosaic_0001>

<bundles_post_ra>
// kernel: tcn_forward.1
= control target key start
LH: loop header
LB: loop body
LE: loop exit
PB: predicated region body
PF: predicated region fallthrough
CT: control target
= control target key end

     0   :  { %vm25_vm0 = vcmask 1041408   ;;  %vm55_vm1 = vcmask 1045504   ;;  %vm40_vm2 = vcmask 1046528   ;;  %vm458_vm4 = vcmask 1043456   ;;  %s3038_s1 = inlined_call_operand.vmem [shape: f32[6,384,128], index: 1, kind: input, shape index: {}]   ;;  %s3039_s0 = inlined_call_operand.vmem [shape: f32[2,16,128], index: 0, kind: input, shape index: {}]   ;;  %s3040_s3 = inlined_call_operand.vmem [shape: f32[10,128], index: 3, kind: input, shape index: {}]   ;;  %s3041_s2 = inlined_call_operand.vmem [shape: f32[4,128,128], index: 2, kind: input, shape index: {}]   ;;  %s3042_s4 = inlined_call_operand.vmem [shape: f32[2,128], index: 4, kind: output, shape index: {}]  }
   0x1   :  { %v117_v0 = vld [vmem:[%s3038_s1 + $0x178] sm:$0xff]  ;;  %v116_v2 = vld [vmem:[%s3038_s1 + $0x170] sm:$0xff]  ;;  %v115_v5 = vld [vmem:[%s3038_s1 + $0x168] sm:$0xff]  ;;  %vm1270_vm6 = vcmask 1041409  }
   0x2   :  { %v85_v1 = vld [vmem:[%s3038_s1 + $0x78] sm:$0xff]  ;;  %178 = vmatpush.msra.mxu2 %v117_v0  ;;  %v84_v3 = vld [vmem:[%s3038_s1 + $0x70] sm:$0xff]  ;;  %v83_v6 = vld [vmem:[%s3038_s1 + $0x68] sm:$0xff] }
   0x3   :  { %120 = vmatpush.msra.mxu0 %v85_v1  ;;  %v101_v4 = vld [vmem:[%s3038_s1 + $0xf8] sm:$0xff]  ;;  %v100_v7 = vld [vmem:[%s3038_s1 + $0xf0] sm:$0xff]  ;;  %v99_v8 = vld [vmem:[%s3038_s1 + $0xe8] sm:$0xff] }
   0x4   :  { %149 = vmatpush.msra.mxu1 %v101_v4  ;;  %179 = vmatpush.msra.mxu2 %v116_v2  ;;  %v114_v9 = vld [vmem:[%s3038_s1 + $0x160] sm:$0xff]  ;;  %v113_v12 = vld [vmem:[%s3038_s1 + $0x158] sm:$0xff]  ;;  %v112_v15 = vld [vmem:[%s3038_s1 + $0x150] sm:$0xff] }
   0x5   :  { %121 = vmatpush.msra.mxu0 %v84_v3  ;;  %v82_v10 = vld [vmem:[%s3038_s1 + $0x60] sm:$0xff]  ;;  %v81_v13 = vld [vmem:[%s3038_s1 + $0x58] sm:$0xff]  ;;  %v80_v16 = vld [vmem:[%s3038_s1 + $0x50] sm:$0xff] }
   0x6   :  { %150 = vmatpush.msra.mxu1 %v100_v7  ;;  %180 = vmatpush.msra.mxu2 %v115_v5  ;;  %v98_v11 = vld [vmem:[%s3038_s1 + $0xe0] sm:$0xff]  ;;  %v97_v14 = vld [vmem:[%s3038_s1 + $0xd8] sm:$0xff]  ;;  %v96_v17 = vld [vmem:[%s3038_s1 + $0xd0] sm:$0xff] }
   0x7   :  { %122 = vmatpush.msra.mxu0 %v83_v6  ;;  %v111_v18 = vld [vmem:[%s3038_s1 + $0x148] sm:$0xff]  ;;  %v110_v21 = vld [vmem:[%s3038_s1 + $0x140] sm:$0xff]  ;;  %v109_v24 = vld [vmem:[%s3038_s1 + $0x138] sm:$0xff] }
   0x8   :  { %151 = vmatpush.msra.mxu1 %v99_v8  ;;  %181 = vmatpush.msra.mxu2 %v114_v9  ;;  %v79_v19 = vld [vmem:[%s3038_s1 + $0x48] sm:$0xff]  ;;  %v78_v22 = vld [vmem:[%s3038_s1 + $0x40] sm:$0xff]  ;;  %v77_v25 = vld [vmem:[%s3038_s1 + $0x38] sm:$0xff] }
   0x9   :  { %123 = vmatpush.msra.mxu0 %v82_v10  ;;  %v95_v20 = vld [vmem:[%s3038_s1 + $0xc8] sm:$0xff]  ;;  %v94_v23 = vld [vmem:[%s3038_s1 + $0xc0] sm:$0xff]  ;;  %v93_v26 = vld [vmem:[%s3038_s1 + $0xb8] sm:$0xff] }
   0xa   :  { %152 = vmatpush.msra.mxu1 %v98_v11  ;;  %182 = vmatpush.msra.mxu2 %v113_v12  ;;  %v1755_v27 = vld [vmem:[%s3039_s0] sm:$0xff]  ;;  %v1760_v28 = vld [vmem:[%s3039_s0 + $0x8] sm:$0xff]  ;;  %v108_v29 = vld [vmem:[%s3038_s1 + $0x130] sm:$0xff] }
   0xb   :  { %124 = vmatpush.msra.mxu0 %v81_v13  ;;  %v76_v30 = vld [vmem:[%s3038_s1 + $0x30] sm:$0xff]  ;;  %v107_v31 = vld [vmem:[%s3038_s1 + $0x128] sm:$0xff]  ;;  %v106_v34 = vld [vmem:[%s3038_s1 + $0x120] sm:$0xff]  ;;  %v26_v35 = vrot.slane %v1755_v27, 6  ;;  %v1782_v36 = vrot.slane %v1760_v28, 6 }
   0xc   :  { %153 = vmatpush.msra.mxu1 %v97_v14  ;;  %183 = vmatpush.msra.mxu2 %v112_v15  ;;  %v92_v32 = vld [vmem:[%s3038_s1 + $0xb0] sm:$0xff]  ;;  %v75_v33 = vld [vmem:[%s3038_s1 + $0x28] sm:$0xff]  ;;  %v74_v37 = vld [vmem:[%s3038_s1 + $0x20] sm:$0xff] }
   0xd   :  { %125 = vmatpush.msra.mxu0 %v80_v16  ;;  %v91_v38 = vld [vmem:[%s3038_s1 + $0xa8] sm:$0xff]  ;;  %v105_v39 = vld [vmem:[%s3038_s1 + $0x118] sm:$0xff]  ;;  %v90_v40 = vld [vmem:[%s3038_s1 + $0xa0] sm:$0xff]  ;;  %v1801_v42 = vsel %vm25_vm0, %v26_v35, %v1782_v36  ;;  %v36_v43 = vsel %vm25_vm0, 0.0, %v26_v35  ;;  %v59_v5 = vrot.slane %v1782_v36, 2  ;;  %v44_v12 = vrot.slane %v1782_v36, 1 }
   0xe   :  { %154 = vmatpush.msra.mxu1 %v96_v17  ;;  %184 = vmatpush.msra.mxu2 %v111_v18  ;;  %v73_v41 = vld [vmem:[%s3038_s1 + $0x18] sm:$0xff]  ;;  %v104_v45 = vld [vmem:[%s3038_s1 + $0x110] sm:$0xff]  ;;  %v56_v48 = vrot.slane %v36_v43, 2  ;;  %v57_v49 = vrot.slane %v1801_v42, 2  ;;  %v103_v50 = vld [vmem:[%s3038_s1 + $0x108] sm:$0xff]  ;;  %v41_v54 = vrot.slane %v36_v43, 1 }
   0xf   :  { %126 = vmatpush.msra.mxu0 %v79_v19  ;;  %v89_v44 = vld [vmem:[%s3038_s1 + $0x98] sm:$0xff]  ;;  %v72_v46 = vld [vmem:[%s3038_s1 + $0x10] sm:$0xff]  ;;  %v71_v51 = vld [vmem:[%s3038_s1 + $0x8] sm:$0xff]  ;;  %v42_v55 = vrot.slane %v1801_v42, 1 }
  0x10   :  { %155 = vmatpush.msra.mxu1 %v95_v20  ;;  %185 = vmatpush.msra.mxu2 %v110_v21  ;;  %v88_v47 = vld [vmem:[%s3038_s1 + $0x90] sm:$0xff]  ;;  %v1317_v52 = vld [vmem:[%s3038_s1 + $0x1f8] sm:$0xff]  ;;  %v87_v53 = vld [vmem:[%s3038_s1 + $0x88] sm:$0xff]  ;;  %v58_v59 = vsel %vm55_vm1, %v56_v48, %v57_v49  ;;  %v60_v17 = vsel %vm55_vm1, %v57_v49, %v59_v5 }
  0x11   :  { %127 = vmatpush.msra.mxu0 %v78_v22  ;;  %v1316_v56 = vld [vmem:[%s3038_s1 + $0x1f0] sm:$0xff]  ;;  %v102_v57 = vld [vmem:[%s3038_s1 + $0x100] sm:$0xff]  ;;  %308 = vmatpush.msra.mxu3 %v1317_v52  ;;  %vm1841_vm3 = vmneg %vm25_vm0  ;;  %v43_v63 = vsel %vm40_vm2, %v41_v54, %v42_v55  ;;  %v45_v22 = vsel %vm40_vm2, %v42_v55, %v44_v12 }
  0x12   :  { %156 = vmatpush.msra.mxu1 %v94_v23  ;;  %186 = vmatpush.msra.mxu2 %v109_v24  ;;  %v70_v58 = vld [vmem:[%s3038_s1] sm:$0xff]  ;;  %v1315_v62 = vld [vmem:[%s3038_s1 + $0x1e8] sm:$0xff]  ;;  %v1855_v0 = vld [vmem:[%s3039_s0 + $0x10] sm:$0xff] }
  0x13   :  { %128 = vmatpush.msra.mxu0 %v77_v25  ;;  %v86_v61 = vld [vmem:[%s3038_s1 + $0x80] sm:$0xff]  ;;  %309 = vmatpush.msra.mxu3 %v1316_v56  ;;  %v1860_v1 = vld [vmem:[%s3039_s0 + $0x18] sm:$0xff]  ;;  %v413_v6 = vld [vmem:[%s3041_s2 + $0x70] sm:$0xff]  ;;  %v29_v8 = vrot.slane %v1855_v0, 6 }
  0x14   :  { %157 = vmatpush.msra.mxu1 %v93_v26  ;;  %187 = vmatpush.msra.mxu2 %v108_v29  ;;  %v414_v2 = vld [vmem:[%s3041_s2 + $0x78] sm:$0xff]  ;;  %v1314_v3 = vld [vmem:[%s3038_s1 + $0x1e0] sm:$0xff]  ;;  %v30_v9 = vrot.slane %v1860_v1, 6  ;;  %v1332_v11 = vld [vmem:[%s3038_s1 + $0x270] sm:$0xff] }
  0x15   :  { %129 = vmatpush.msra.mxu0 %v76_v30  ;;  %v1333_v4 = vld [vmem:[%s3038_s1 + $0x278] sm:$0xff]  ;;  %310 = vmatpush.msra.mxu3 %v1315_v62  ;;  %v412_v13 = vld [vmem:[%s3041_s2 + $0x68] sm:$0xff]  ;;  %v1348_v14 = vld [vmem:[%s3038_s1 + $0x2f0] sm:$0xff]  ;;  %v37_v19 = vsel %vm25_vm0, 0.0, %v29_v8 }
  0x16   :  { %158 = vmatpush.msra.mxu1 %v92_v32  ;;  %188 = vmatpush.msra.mxu2 %v107_v31  ;;  %v1349_v7 = vld [vmem:[%s3038_s1 + $0x2f8] sm:$0xff]  ;;  %v1312_v15 = vld [vmem:[%s3038_s1 + $0x1d0] sm:$0xff]  ;;  %v1331_v16 = vld [vmem:[%s3038_s1 + $0x268] sm:$0xff]  ;;  %v31_v18 = vsel %vm25_vm0, %v29_v8, %v30_v9  ;;  %v61_v26 = vrot.slane %v37_v19, 2 }
  0x17   :  { %130 = vmatpush.msra.mxu0 %v75_v33  ;;  %v1313_v10 = vld [vmem:[%s3038_s1 + $0x1d8] sm:$0xff]  ;;  %311 = vmatpush.msra.mxu3 %v1314_v3  ;;  %v1311_v20 = vld [vmem:[%s3038_s1 + $0x1c8] sm:$0xff]  ;;  %v411_v21 = vld [vmem:[%s3041_s2 + $0x60] sm:$0xff]  ;;  %v62_v29 = vrot.slane %v31_v18, 2 }
  0x18   :  { %159 = vmatpush.msra.mxu1 %v91_v38  ;;  %189 = vmatpush.msra.mxu2 %v106_v34  ;;  %v1330_v23 = vld [vmem:[%s3038_s1 + $0x260] sm:$0xff]  ;;  %v1347_v25 = vld [vmem:[%s3038_s1 + $0x2e8] sm:$0xff]  ;;  %v410_v30 = vld [vmem:[%s3041_s2 + $0x58] sm:$0xff]  ;;  %v46_v34 = vrot.slane %v37_v19, 1 }
  0x19   :  { %131 = vmatpush.msra.mxu0 %v74_v37  ;;  %312 = vmatpush.msra.mxu3 %v1313_v10  ;;  %v1310_v24 = vld [vmem:[%s3038_s1 + $0x1c0] sm:$0xff]  ;;  %v1329_v31 = vld [vmem:[%s3038_s1 + $0x258] sm:$0xff]  ;;  %v409_v36 = vld [vmem:[%s3041_s2 + $0x50] sm:$0xff]  ;;  %v63_v38 = vsel %vm55_vm1, %v61_v26, %v62_v29 }
  0x1a   :  { %160 = vmatpush.msra.mxu1 %v90_v40  ;;  %190 = vmatpush.msra.mxu2 %v105_v39  ;;  %v1309_v32 = vld [vmem:[%s3038_s1 + $0x1b8] sm:$0xff]  ;;  %v1346_v33 = vld [vmem:[%s3038_s1 + $0x2e0] sm:$0xff]  ;;  %v1308_v37 = vld [vmem:[%s3038_s1 + $0x1b0] sm:$0xff]  ;;  %v64_v40 = vrot.slane %v30_v9, 2 }
  0x1b   :  { %132 = vmatpush.msra.mxu0 %v73_v41  ;;  %313 = vmatpush.msra.mxu3 %v1312_v15  ;;  %v49_v41 = vrot.slane %v30_v9, 1  ;;  %v1306_v48 = vld [vmem:[%s3038_s1 + $0x1a0] sm:$0xff]  ;;  %v1344_v49 = vld [vmem:[%s3038_s1 + $0x2d0] sm:$0xff]  ;;  %v1305_v52 = vld [vmem:[%s3038_s1 + $0x198] sm:$0xff] }
  0x1c   :  { %161 = vmatpush.msra.mxu1 %v89_v44  ;;  %191 = vmatpush.msra.mxu2 %v104_v45  ;;  %v1307_v44 = vld [vmem:[%s3038_s1 + $0x1a8] sm:$0xff]  ;;  %v1345_v45 = vld [vmem:[%s3038_s1 + $0x2d8] sm:$0xff]  ;;  %v1326_v54 = vld [vmem:[%s3038_s1 + $0x240] sm:$0xff] }
  0x1d   :  { %133 = vmatpush.msra.mxu0 %v72_v46  ;;  %314 = vmatpush.msra.mxu3 %v1311_v20  ;;  %v1328_v46 = vld [vmem:[%s3038_s1 + $0x250] sm:$0xff]  ;;  %v406_v55 = vld [vmem:[%s3041_s2 + $0x38] sm:$0xff]  ;;  %v1302_v3 = vld [vmem:[%s3038_s1 + $0x180] sm:$0xff] }
  0x1e   :  { %162 = vmatpush.msra.mxu1 %v88_v47  ;;  %192 = vmatpush.msra.mxu2 %v103_v50  ;;  %v408_v47 = vld [vmem:[%s3041_s2 + $0x48] sm:$0xff]  ;;  %v1304_v56 = vld [vmem:[%s3038_s1 + $0x190] sm:$0xff]  ;;  %v1341_v62 = vld [vmem:[%s3038_s1 + $0x2b8] sm:$0xff] }
  0x1f   :  { %134 = vmatpush.msra.mxu0 %v71_v51  ;;  %315 = vmatpush.msra.mxu3 %v1310_v24  ;;  %v1327_v50 = vld [vmem:[%s3038_s1 + $0x248] sm:$0xff]  ;;  %v407_v51 = vld [vmem:[%s3041_s2 + $0x40] sm:$0xff]  ;;  %v402_v9 = vld [vmem:[%s3041_s2 + $0x18] sm:$0xff] }
  0x20   :  { %163 = vmatpush.msra.mxu1 %v87_v53  ;;  %193 = vmatpush.msra.mxu2 %v102_v57  ;;  %v1343_v53 = vld [vmem:[%s3038_s1 + $0x2c8] sm:$0xff]  ;;  %v1342_v57 = vld [vmem:[%s3038_s1 + $0x2c0] sm:$0xff]  ;;  %v401_v12 = vld [vmem:[%s3041_s2 + $0x10] sm:$0xff] }
  0x21   :  { %135 = vmatpush.msra.mxu0 %v70_v58  ;;  %194 = vmatmul.f32.vlgmr.msra.gmra.mxu2 %v58_v59  ;;  %v1325_v58 = vld [vmem:[%s3038_s1 + $0x238] sm:$0xff]  ;;  %v405_v59 = vld [vmem:[%s3041_s2 + $0x30] sm:$0xff]  ;;  %v1323_v5 = vld [vmem:[%s3038_s1 + $0x228] sm:$0xff] }
  0x22   :  { %1299 = vmatmul.msk.f32.vlgmr.msra.gmra.mxu0 %vm1841_vm3, %v26_v35  ;;  %164 = vmatpush.msra.mxu1 %v86_v61  ;;  %v47_v35 = vrot.slane %v31_v18, 1  ;;  %v1303_v61 = vld [vmem:[%s3038_s1 + $0x188] sm:$0xff]  ;;  %v1338_v10 = vld [vmem:[%s3038_s1 + $0x2a0] sm:$0xff]  ;;  %vm2276_vm5 = vmneg %vm458_vm4 }
  0x23   :  { %165 = vmatmul.f32.vlgmr.msra.gmra.mxu1 %v43_v63  ;;  %417 = vmatpush.msrb.mxu2 %v414_v2  ;;  %v1324_v63 = vld [vmem:[%s3038_s1 + $0x230] sm:$0xff]  ;;  %v404_v2 = vld [vmem:[%s3041_s2 + $0x28] sm:$0xff]  ;;  %v1318_v20 = vld [vmem:[%s3038_s1 + $0x200] sm:$0xff] }
  0x24   :  { %337 = vmatpush.msrb.mxu0 %v1333_v4  ;;  %366 = vmatpush.msrb.mxu1 %v1349_v7  ;;  %v48_v39 = vsel %vm40_vm2, %v46_v34, %v47_v35  ;;  %v50_v43 = vsel %vm40_vm2, %v47_v35, %v49_v41  ;;  %v1340_v4 = vld [vmem:[%s3038_s1 + $0x2b0] sm:$0xff]  ;;  %v1339_v7 = vld [vmem:[%s3038_s1 + $0x2a8] sm:$0xff] }
  0x25   :  { %418 = vmatpush.msrb.mxu2 %v413_v6  ;;  %316 = vmatpush.msra.mxu3 %v1309_v32  ;;  %v403_v6 = vld [vmem:[%s3041_s2 + $0x20] sm:$0xff]  ;;  %v400_v15 = vld [vmem:[%s3041_s2 + $0x8] sm:$0xff] }
  0x26   :  { %338 = vmatpush.msrb.mxu0 %v1332_v11  ;;  %367 = vmatpush.msrb.mxu1 %v1348_v14  ;;  %v1321_v11 = vld [vmem:[%s3038_s1 + $0x218] sm:$0xff]  ;;  %v1320_v14 = vld [vmem:[%s3038_s1 + $0x210] sm:$0xff]  ;;  %v1335_v19 = vld [vmem:[%s3038_s1 + $0x288] sm:$0xff] }
  0x27   :  { %419 = vmatpush.msrb.mxu2 %v412_v13  ;;  %317 = vmatpush.msra.mxu3 %v1308_v37  ;;  %v1337_v13 = vld [vmem:[%s3038_s1 + $0x298] sm:$0xff] }
  0x28   :  { %339 = vmatpush.msrb.mxu0 %v1331_v16  ;;  %368 = vmatpush.msrb.mxu1 %v1347_v25  ;;  %v1336_v16 = vld [vmem:[%s3038_s1 + $0x290] sm:$0xff] }
  0x29   :  { %197 = vmatmul.f32.gmra.mxu2 %v60_v17  ;;  %318 = vmatpush.msra.mxu3 %v1307_v44  ;;  %v1319_v17 = vld [vmem:[%s3038_s1 + $0x208] sm:$0xff] }
  0x2a   :  { %139 = vmatmul.f32.gmra.mxu0 %v1801_v42  ;;  %420 = vmatpush.msrb.mxu2 %v411_v21  ;;  %v65_v42 = vsel %vm55_vm1, %v62_v29, %v64_v40  ;;  %v1334_v21 = vld [vmem:[%s3038_s1 + $0x280] sm:$0xff]  ;;  %v1368_v40 = vld [vmem:[%s3038_s1 + $0x370] sm:$0xff] }
  0x2b   :  { %168 = vmatmul.f32.gmra.mxu1 %v45_v22  ;;  %340 = vmatpush.msrb.mxu0 %v1330_v23  ;;  %v1635_v22 = vld [vmem:[%s3040_s3] ss:$0 sm:$0xff] }
  0x2c   :  { %421 = vmatpush.msrb.mxu2 %v410_v30  ;;  %369 = vmatpush.msrb.mxu1 %v1346_v33 }
  0x2d   :  { %341 = vmatpush.msrb.mxu0 %v1329_v31  ;;  %319 = vmatpush.msra.mxu3 %v1306_v48 }
  0x2e   :  { %422 = vmatpush.msrb.mxu2 %v409_v36  ;;  %370 = vmatpush.msrb.mxu1 %v1345_v45  ;;  %v1367_v45 = vld [vmem:[%s3038_s1 + $0x368] sm:$0xff] }
  0x2f   :  { %342 = vmatpush.msrb.mxu0 %v1328_v46  ;;  %320 = vmatpush.msra.mxu3 %v1305_v52 }
  0x30   :  { %423 = vmatpush.msrb.mxu2 %v408_v47  ;;  %371 = vmatpush.msrb.mxu1 %v1344_v49 }
  0x31   :  { %200 = vmatmul.f32.gmra.mxu2 %v63_v38  ;;  %343 = vmatpush.msrb.mxu0 %v1327_v50 }
  0x32   :  { %1301 = vmatmul.msk.f32.gmra.mxu0 %vm1841_vm3, %v29_v8  ;;  %424 = vmatpush.msrb.mxu2 %v407_v51  ;;  %v1322_v8 = vld [vmem:[%s3038_s1 + $0x220] sm:$0xff] }
  0x33   :  { %171 = vmatmul.f32.gmra.mxu1 %v48_v39  ;;  %344 = vmatpush.msrb.mxu0 %v1326_v54 }
  0x34   :  { %372 = vmatpush.msrb.mxu1 %v1343_v53  ;;  %425 = vmatpush.msrb.mxu2 %v406_v55  ;;  %v1366_v53 = vld [vmem:[%s3038_s1 + $0x360] sm:$0xff] }
  0x35   :  { %321 = vmatpush.msra.mxu3 %v1304_v56  ;;  %345 = vmatpush.msrb.mxu0 %v1325_v58 }
  0x36   :  { %373 = vmatpush.msrb.mxu1 %v1342_v57  ;;  %426 = vmatpush.msrb.mxu2 %v405_v59  ;;  %v1365_v59 = vld [vmem:[%s3038_s1 + $0x358] sm:$0xff] }
  0x37   :  { %322 = vmatpush.msra.mxu3 %v1303_v61  ;;  %346 = vmatpush.msrb.mxu0 %v1324_v63 }
  0x38   :  { %374 = vmatpush.msrb.mxu1 %v1341_v62  ;;  %427 = vmatpush.msrb.mxu2 %v404_v2 }
  0x39   :  { %203 = vmatmul.f32.gmra.mxu2 %v65_v42  ;;  %323 = vmatpush.msra.mxu3 %v1302_v3 }
  0x3a   :  { %145 = vmatmul.f32.gmra.mxu0 %v31_v18  ;;  %375 = vmatpush.msrb.mxu1 %v1340_v4  ;;  %v399_v18 = vld [vmem:[%s3041_s2] sm:$0xff]  ;;  %v1364_v4 = vld [vmem:[%s3038_s1 + $0x350] sm:$0xff] }
  0x3b   :  { %174 = vmatmul.f32.gmra.mxu1 %v50_v43  ;;  %347 = vmatpush.msrb.mxu0 %v1323_v5 }
  0x3c   :  { %428 = vmatpush.msrb.mxu2 %v403_v6  ;;  %376 = vmatpush.msrb.mxu1 %v1339_v7 }
  0x3d   :  { %348 = vmatpush.msrb.mxu0 %v1322_v8 }
  0x3e   :  { %429 = vmatpush.msrb.mxu2 %v402_v9  ;;  %377 = vmatpush.msrb.mxu1 %v1338_v10 }
  0x3f   :  { %349 = vmatpush.msrb.mxu0 %v1321_v11 }
  0x40   :  { %430 = vmatpush.msrb.mxu2 %v401_v12  ;;  %378 = vmatpush.msrb.mxu1 %v1337_v13 }
  0x41   :  { %350 = vmatpush.msrb.mxu0 %v1320_v14 }
  0x42   :  { %431 = vmatpush.msrb.mxu2 %v400_v15  ;;  %379 = vmatpush.msrb.mxu1 %v1336_v16 }
  0x43   :  { %351 = vmatpush.msrb.mxu0 %v1319_v17 }
  0x44   :  { %432 = vmatpush.msrb.mxu2 %v399_v18  ;;  %380 = vmatpush.msrb.mxu1 %v1335_v19 }
  0x45   :  { %433 = vmatmul.f32.vlgmr.msrb.gmra.mxu2 %v1755_v27  ;;  %352 = vmatpush.msrb.mxu0 %v1318_v20 }
  0x46   :  { %381 = vmatpush.msrb.mxu1 %v1334_v21 }
  0x4d   :  { %436 = vmatmul.f32.gmra.mxu2 %v1760_v28 }
  0x55   :  { %439 = vmatmul.f32.gmra.mxu2 %v1855_v0  ;;  %v1369_v0 = vld [vmem:[%s3038_s1 + $0x378] sm:$0xff] }
  0x56   :  { %552 = vmatpush.msrb.mxu3 %v1369_v0  ;;  %v1357_v0 = vld [vmem:[%s3038_s1 + $0x318] sm:$0xff] }
  0x58   :  { %553 = vmatpush.msrb.mxu3 %v1368_v40  ;;  %v1395_v40 = vld [vmem:[%s3038_s1 + $0x448] sm:$0xff] }
  0x5a   :  { %554 = vmatpush.msrb.mxu3 %v1367_v45  ;;  %v1393_v45 = vld [vmem:[%s3038_s1 + $0x438] sm:$0xff] }
  0x5c   :  { %555 = vmatpush.msrb.mxu3 %v1366_v53  ;;  %v1373_v53 = vld [vmem:[%s3038_s1 + $0x398] sm:$0xff] }
  0x5d   :  { %442 = vmatmul.f32.gmra.mxu2 %v1860_v1  ;;  %v1385_v1 = vld [vmem:[%s3038_s1 + $0x3f8] sm:$0xff] }
  0x5e   :  { %581 = vmatpush.msra.mxu0 %v1385_v1  ;;  %556 = vmatpush.msrb.mxu3 %v1365_v59  ;;  %v1355_v1 = vld [vmem:[%s3038_s1 + $0x308] sm:$0xff]  ;;  %v1370_v59 = vld [vmem:[%s3038_s1 + $0x380] sm:$0xff] }
  0x60   :  { %557 = vmatpush.msrb.mxu3 %v1364_v4  ;;  %v1472_v4 = vld [vmem:[%s3041_s2 + $0xf0] sm:$0xff] }
  0x9f   :  { %v137_v23 = vpop.f32.mrf.mxu0 }
  0xa0   :  { %v138_v24 = vadd.f32 %v1635_v22, %v137_v23  ;;  %v166_v25 = vpop.f32.mrf.mxu1  ;;  %v1401_v23 = vld [vmem:[%s3038_s1 + $0x478] sm:$0xff] }
  0xa1   :  { %610 = vmatpush.msra.mxu1 %v1401_v23 }
  0xa2   :  { %v167_v26 = vadd.f32 %v166_v25, %v138_v24  ;;  %v1384_v24 = vld [vmem:[%s3038_s1 + $0x3f0] sm:$0xff]  ;;  %v1362_v25 = vld [vmem:[%s3038_s1 + $0x340] sm:$0xff] }
  0xa3   :  { %582 = vmatpush.msra.mxu0 %v1384_v24 }
  0xa4   :  { %v195_v29 = vpop.f32.mrf.mxu2 }
  0xa5   :  { %v196_v30 = vadd.f32 %v195_v29, %v167_v26  ;;  %v1400_v26 = vld [vmem:[%s3038_s1 + $0x470] sm:$0xff]  ;;  %v1383_v29 = vld [vmem:[%s3038_s1 + $0x3e8] sm:$0xff] }
  0xa6   :  { %611 = vmatpush.msra.mxu1 %v1400_v26  ;;  %583 = vmatpush.msra.mxu0 %v1383_v29  ;;  %v1465_v26 = vld [vmem:[%s3041_s2 + $0xb8] sm:$0xff]  ;;  %v1464_v29 = vld [vmem:[%s3041_s2 + $0xb0] sm:$0xff] }
  0xa7   :  { %v140_v27 = vpop.f32.mrf.mxu0  ;;  %v207_v31 = vmax.f32 %v196_v30, 0.0  ;;  %v1361_v30 = vld [vmem:[%s3038_s1 + $0x338] sm:$0xff] }
  0xa8   :  { %v141_v32 = vadd.f32 %v1635_v22, %v140_v27  ;;  %v169_v33 = vpop.f32.mrf.mxu1  ;;  %v1399_v27 = vld [vmem:[%s3038_s1 + $0x468] sm:$0xff] }
  0xa9   :  { %v215_v34 = vrot.slane %v207_v31, 6  ;;  %v1382_v31 = vld [vmem:[%s3038_s1 + $0x3e0] sm:$0xff]  ;;  %612 = vmatpush.msra.mxu1 %v1399_v27 }
  0xaa   :  { %v170_v35 = vadd.f32 %v169_v33, %v141_v32  ;;  %v1360_v32 = vld [vmem:[%s3038_s1 + $0x330] sm:$0xff]  ;;  %v1398_v33 = vld [vmem:[%s3038_s1 + $0x460] sm:$0xff]  ;;  %584 = vmatpush.msra.mxu0 %v1382_v31 }
  0xab   :  { %1351 = vmatmul.msk.f32.vlgmr.msra.gmra.mxu3 %vm1841_vm3, %v215_v34  ;;  %v225_v42 = vsel %vm25_vm0, 0.0, %v215_v34  ;;  %613 = vmatpush.msra.mxu1 %v1398_v33 }
  0xac   :  { %v198_v36 = vpop.f32.mrf.mxu2  ;;  %v229_v50 = vrot.slane %v225_v42, 1  ;;  %v243_v51 = vrot.slane %v225_v42, 2  ;;  %v1356_v42 = vld [vmem:[%s3038_s1 + $0x310] sm:$0xff] }
  0xad   :  { %v199_v37 = vadd.f32 %v198_v36, %v170_v35  ;;  %v1359_v35 = vld [vmem:[%s3038_s1 + $0x328] sm:$0xff]  ;;  %v1397_v36 = vld [vmem:[%s3038_s1 + $0x458] sm:$0xff] }
  0xae   :  { %614 = vmatpush.msra.mxu1 %v1397_v36  ;;  %v1462_v36 = vld [vmem:[%s3041_s2 + $0xa0] sm:$0xff] }
  0xaf   :  { %v143_v28 = vpop.f32.mrf.mxu0  ;;  %v208_v38 = vmax.f32 %v199_v37, 0.0  ;;  %v1380_v37 = vld [vmem:[%s3038_s1 + $0x3d0] sm:$0xff] }
  0xb0   :  { %v144_v39 = vadd.f32 %v1635_v22, %v143_v28  ;;  %v172_v41 = vpop.f32.mrf.mxu1  ;;  %v1358_v28 = vld [vmem:[%s3038_s1 + $0x320] sm:$0xff] }
  0xb1   :  { %v216_v43 = vrot.slane %v208_v38, 6  ;;  %v1396_v38 = vld [vmem:[%s3038_s1 + $0x450] sm:$0xff] }
  0xb2   :  { %v173_v44 = vadd.f32 %v172_v41, %v144_v39  ;;  %615 = vmatpush.msra.mxu1 %v1396_v38  ;;  %v1379_v39 = vld [vmem:[%s3038_s1 + $0x3c8] sm:$0xff]  ;;  %v1378_v41 = vld [vmem:[%s3038_s1 + $0x3c0] sm:$0xff] }
  0xb3   :  { %v217_v46 = vsel %vm25_vm0, %v215_v34, %v216_v43  ;;  %v232_v2 = vrot.slane %v216_v43, 1  ;;  %v246_v3 = vrot.slane %v216_v43, 2  ;;  %v1381_v34 = vld [vmem:[%s3038_s1 + $0x3d8] sm:$0xff]  ;;  %v1394_v43 = vld [vmem:[%s3038_s1 + $0x440] sm:$0xff] }
  0xb4   :  { %v201_v47 = vpop.f32.mrf.mxu2  ;;  %v230_v48 = vrot.slane %v217_v46, 1  ;;  %v244_v49 = vrot.slane %v217_v46, 2  ;;  %327 = vmatmul.f32.gmra.mxu3 %v217_v46  ;;  %585 = vmatpush.msra.mxu0 %v1381_v34  ;;  %v1376_v46 = vld [vmem:[%s3038_s1 + $0x3b0] sm:$0xff]  ;;  %v1463_v34 = vld [vmem:[%s3041_s2 + $0xa8] sm:$0xff] }
  0xb5   :  { %v202_v52 = vadd.f32 %v201_v47, %v173_v44  ;;  %616 = vmatpush.msra.mxu1 %v1395_v40  ;;  %v1377_v44 = vld [vmem:[%s3038_s1 + $0x3b8] sm:$0xff]  ;;  %v1354_v47 = vld [vmem:[%s3038_s1 + $0x300] sm:$0xff] }
  0xb6   :  { %v231_v54 = vsel %vm40_vm2, %v229_v50, %v230_v48  ;;  %v245_v55 = vsel %vm55_vm1, %v243_v51, %v244_v49  ;;  %v233_v7 = vsel %vm40_vm2, %v230_v48, %v232_v2  ;;  %v247_v8 = vsel %vm55_vm1, %v244_v49, %v246_v3  ;;  %586 = vmatpush.msra.mxu0 %v1380_v37  ;;  %v1392_v48 = vld [vmem:[%s3038_s1 + $0x430] sm:$0xff]  ;;  %v1375_v49 = vld [vmem:[%s3038_s1 + $0x3a8] sm:$0xff]  ;;  %v1374_v51 = vld [vmem:[%s3038_s1 + $0x3a0] sm:$0xff] }
  0xb7   :  { %v146_v56 = vpop.f32.mrf.mxu0  ;;  %v209_v57 = vmax.f32 %v202_v52, 0.0  ;;  %353 = vmatmul.f32.vlgmr.msrb.gmra.mxu0 %v231_v54  ;;  %382 = vmatmul.f32.vlgmr.msrb.gmra.mxu1 %v245_v55  ;;  %v1391_v50 = vld [vmem:[%s3038_s1 + $0x428] sm:$0xff]  ;;  %v1390_v52 = vld [vmem:[%s3038_s1 + $0x420] sm:$0xff]  ;;  %v1389_v54 = vld [vmem:[%s3038_s1 + $0x418] sm:$0xff] }
  0xb8   :  { %v147_v58 = vadd.f32 %v1635_v22, %v146_v56  ;;  %v175_v61 = vpop.f32.mrf.mxu1  ;;  %v1363_v22 = vld [vmem:[%s3038_s1 + $0x348] sm:$0xff]  ;;  %587 = vmatpush.msra.mxu0 %v1379_v39  ;;  %617 = vmatpush.msra.mxu1 %v1394_v43  ;;  %v1372_v55 = vld [vmem:[%s3038_s1 + $0x390] sm:$0xff]  ;;  %v2235_v3 = vld [vmem:[%s3040_s3 + $0x1] ss:$0 sm:$0xff] }
  0xb9   :  { %v218_v62 = vrot.slane %v209_v57, 6  ;;  %558 = vmatpush.msrb.mxu3 %v1363_v22  ;;  %v1388_v56 = vld [vmem:[%s3038_s1 + $0x410] sm:$0xff]  ;;  %v1371_v57 = vld [vmem:[%s3038_s1 + $0x388] sm:$0xff] }
  0xba   :  { %v176_v63 = vadd.f32 %v175_v61, %v147_v58  ;;  %588 = vmatpush.msra.mxu0 %v1378_v41  ;;  %618 = vmatpush.msra.mxu1 %v1393_v45  ;;  %v1387_v58 = vld [vmem:[%s3038_s1 + $0x408] sm:$0xff]  ;;  %v1386_v61 = vld [vmem:[%s3038_s1 + $0x400] sm:$0xff]  ;;  %v1460_v43 = vld [vmem:[%s3041_s2 + $0x90] sm:$0xff] }
  0xbb   :  { %v226_v11 = vsel %vm25_vm0, 0.0, %v218_v62  ;;  %559 = vmatpush.msrb.mxu3 %v1362_v25 }
  0xbc   :  { %v204_v5 = vpop.f32.mrf.mxu2  ;;  %1353 = vmatmul.msk.f32.gmra.mxu3 %vm1841_vm3, %v218_v62  ;;  %v234_v15 = vrot.slane %v226_v11, 1  ;;  %v248_v60 = vrot.slane %v226_v11, 2  ;;  %589 = vmatpush.msra.mxu0 %v1377_v44 }
  0xbd   :  { %v205_v6 = vadd.f32 %v204_v5, %v176_v63  ;;  %560 = vmatpush.msrb.mxu3 %v1361_v30  ;;  %619 = vmatpush.msra.mxu1 %v1392_v48  ;;  %v1471_v5 = vld [vmem:[%s3041_s2 + $0xe8] sm:$0xff]  ;;  %v1520_v30 = vld [vmem:[%s3038_s1 + $0x770] sm:$0xff] }
  0xbe   :  { %590 = vmatpush.msra.mxu0 %v1376_v46 }
  0xbf   :  { %v210_v9 = vmax.f32 %v205_v6, 0.0  ;;  %356 = vmatmul.f32.gmra.mxu0 %v233_v7  ;;  %385 = vmatmul.f32.gmra.mxu1 %v247_v8  ;;  %v2247_v7 = vld [vmem:[%s3040_s3 + $0x2] ss:$0 sm:$0xff] }
  0xc0   :  { %561 = vmatpush.msrb.mxu3 %v1360_v32  ;;  %591 = vmatpush.msra.mxu0 %v1375_v49  ;;  %v1470_v8 = vld [vmem:[%s3041_s2 + $0xe0] sm:$0xff] }
  0xc1   :  { %v219_v10 = vrot.slane %v210_v9, 6  ;;  %620 = vmatpush.msra.mxu1 %v1391_v50 }
  0xc2   :  { %562 = vmatpush.msrb.mxu3 %v1359_v35  ;;  %592 = vmatpush.msra.mxu0 %v1374_v51  ;;  %v1458_v51 = vld [vmem:[%s3041_s2 + $0x80] sm:$0xff] }
  0xc3   :  { %v220_v12 = vsel %vm25_vm0, %v218_v62, %v219_v10  ;;  %v237_v18 = vrot.slane %v219_v10, 1  ;;  %v251_v19 = vrot.slane %v219_v10, 2  ;;  %621 = vmatpush.msra.mxu1 %v1390_v52  ;;  %v1473_v62 = vld [vmem:[%s3041_s2 + $0xf8] sm:$0xff] }
  0xc4   :  { %v235_v13 = vrot.slane %v220_v12, 1  ;;  %v249_v14 = vrot.slane %v220_v12, 2  ;;  %333 = vmatmul.f32.gmra.mxu3 %v220_v12  ;;  %593 = vmatpush.msra.mxu0 %v1373_v53  ;;  %v1469_v12 = vld [vmem:[%s3041_s2 + $0xd8] sm:$0xff] }
  0xc5   :  { %563 = vmatpush.msrb.mxu3 %v1358_v28  ;;  %622 = vmatpush.msra.mxu1 %v1389_v54 }
  0xc6   :  { %v236_v16 = vsel %vm40_vm2, %v234_v15, %v235_v13  ;;  %v250_v17 = vsel %vm55_vm1, %v248_v60, %v249_v14  ;;  %v238_v20 = vsel %vm40_vm2, %v235_v13, %v237_v18  ;;  %v252_v21 = vsel %vm55_vm1, %v249_v14, %v251_v19  ;;  %594 = vmatpush.msra.mxu0 %v1372_v55  ;;  %v1468_v60 = vld [vmem:[%s3041_s2 + $0xd0] sm:$0xff]  ;;  %v1467_v18 = vld [vmem:[%s3041_s2 + $0xc8] sm:$0xff]  ;;  %v1466_v19 = vld [vmem:[%s3041_s2 + $0xc0] sm:$0xff] }
  0xc7   :  { %359 = vmatmul.f32.gmra.mxu0 %v236_v16  ;;  %388 = vmatmul.f32.gmra.mxu1 %v250_v17 }
  0xc8   :  { %564 = vmatpush.msrb.mxu3 %v1357_v0  ;;  %623 = vmatpush.msra.mxu1 %v1388_v56  ;;  %v434_v2 = vpop.f32.mrf.mxu2 }
  0xc9   :  { %595 = vmatpush.msra.mxu0 %v1371_v57  ;;  %v435_v15 = vadd.f32 %v2247_v7, %v434_v2 }
  0xca   :  { %565 = vmatpush.msrb.mxu3 %v1356_v42  ;;  %624 = vmatpush.msra.mxu1 %v1387_v58  ;;  %v1461_v42 = vld [vmem:[%s3041_s2 + $0x98] sm:$0xff] }
  0xcb   :  { %596 = vmatpush.msra.mxu0 %v1370_v59 }
  0xcc   :  { %566 = vmatpush.msrb.mxu3 %v1355_v1  ;;  %625 = vmatpush.msra.mxu1 %v1386_v61 }
  0xce   :  { %567 = vmatpush.msrb.mxu3 %v1354_v47  ;;  %850 = vmatpush.msrb.mxu1 %v1473_v62  ;;  %v1459_v47 = vld [vmem:[%s3041_s2 + $0x88] sm:$0xff] }
  0xcf   :  { %362 = vmatmul.f32.gmra.mxu0 %v238_v20  ;;  %391 = vmatmul.f32.gmra.mxu1 %v252_v21 }
  0xd0   :  { %851 = vmatpush.msrb.mxu1 %v1472_v4  ;;  %v437_v16 = vpop.f32.mrf.mxu2 }
  0xd1   :  { %v438_v33 = vadd.f32 %v2247_v7, %v437_v16 }
  0xd2   :  { %852 = vmatpush.msrb.mxu1 %v1471_v5 }
  0xd4   :  { %853 = vmatpush.msrb.mxu1 %v1470_v8 }
  0xd6   :  { %854 = vmatpush.msrb.mxu1 %v1469_v12 }
  0xd8   :  { %855 = vmatpush.msrb.mxu1 %v1468_v60  ;;  %v440_v37 = vpop.f32.mrf.mxu2 }
  0xd9   :  { %v441_v45 = vadd.f32 %v2247_v7, %v440_v37  ;;  %v1418_v37 = vld [vmem:[%s3038_s1 + $0x4e0] sm:$0xff] }
  0xda   :  { %856 = vmatpush.msrb.mxu1 %v1467_v18 }
  0xdc   :  { %857 = vmatpush.msrb.mxu1 %v1466_v19 }
  0xde   :  { %858 = vmatpush.msrb.mxu1 %v1465_v26 }
  0xe0   :  { %859 = vmatpush.msrb.mxu1 %v1464_v29  ;;  %v443_v62 = vpop.f32.mrf.mxu2 }
  0xe2   :  { %860 = vmatpush.msrb.mxu1 %v1463_v34  ;;  %v1453_v34 = vld [vmem:[%s3038_s1 + $0x5f8] sm:$0xff] }
  0xe3   :  { %798 = vmatpush.msrb.mxu0 %v1453_v34 }
  0xe4   :  { %861 = vmatpush.msrb.mxu1 %v1462_v36  ;;  %v1452_v36 = vld [vmem:[%s3038_s1 + $0x5f0] sm:$0xff] }
  0xe5   :  { %799 = vmatpush.msrb.mxu0 %v1452_v36 }
  0xe6   :  { %862 = vmatpush.msrb.mxu1 %v1461_v42  ;;  %v1414_v42 = vld [vmem:[%s3038_s1 + $0x4c0] sm:$0xff] }
  0xe8   :  { %863 = vmatpush.msrb.mxu1 %v1460_v43  ;;  %v1434_v43 = vld [vmem:[%s3038_s1 + $0x560] sm:$0xff] }
  0xea   :  { %864 = vmatpush.msrb.mxu1 %v1459_v47  ;;  %v1410_v47 = vld [vmem:[%s3038_s1 + $0x4a0] sm:$0xff] }
  0xec   :  { %865 = vmatpush.msrb.mxu1 %v1458_v51  ;;  %v1447_v51 = vld [vmem:[%s3038_s1 + $0x5c8] sm:$0xff] }
 0x12e   :  { %v325_v63 = vpop.f32.mrf.mxu3 }
 0x12f   :  { %v326_v6 = vadd.f32 %v2235_v3, %v325_v63 }
 0x134   :  { %v354_v9 = vpop.f32.mrf.mxu0  ;;  %v383_v10 = vpop.f32.mrf.mxu1 }
 0x135   :  { %v355_v11 = vadd.f32 %v354_v9, %v326_v6  ;;  %v444_v6 = vadd.f32 %v2247_v7, %v443_v62  ;;  %v1427_v62 = vld [vmem:[%s3038_s1 + $0x528] sm:$0xff] }
 0x137   :  { %v384_v13 = vadd.f32 %v383_v10, %v355_v11  ;;  %v328_v14 = vpop.f32.mrf.mxu3 }
 0x138   :  { %v329_v20 = vadd.f32 %v2235_v3, %v328_v14 }
 0x139   :  { %v395_v17 = vmax.f32 %v384_v13, 0.0 }
 0x13b   :  { %v2266_v21 = vadd.f32 %v435_v15, %v395_v17 }
 0x13c   :  { %v357_v22 = vpop.f32.mrf.mxu0  ;;  %v386_v23 = vpop.f32.mrf.mxu1 }
 0x13d   :  { %v450_v24 = vmax.f32 %v2266_v21, 0.0  ;;  %v358_v25 = vadd.f32 %v357_v22, %v329_v20  ;;  %v1413_v21 = vld [vmem:[%s3038_s1 + $0x4b8] sm:$0xff] }
 0x13f   :  { %v459_v27 = vrot.slane %v450_v24, 4  ;;  %v387_v31 = vadd.f32 %v386_v23, %v358_v25  ;;  %v331_v32 = vpop.f32.mrf.mxu3 }
 0x140   :  { %v332_v28 = vadd.f32 %v2235_v3, %v331_v32  ;;  %v1419_v32 = vld [vmem:[%s3038_s1 + $0x4e8] sm:$0xff] }
 0x141   :  { %v396_v35 = vmax.f32 %v387_v31, 0.0  ;;  %1403 = vmatmul.msk.f32.vlgmr.msrb.gmra.mxu3 %vm2276_vm5, %v459_v27  ;;  %v469_v46 = vsel %vm458_vm4, 0.0, %v459_v27  ;;  %v1420_v31 = vld [vmem:[%s3038_s1 + $0x4f0] sm:$0xff] }
 0x142   :  { %v473_v54 = vrot.slane %v469_v46, 2  ;;  %v487_v55 = vrot.slane %v469_v46, 4  ;;  %v1432_v46 = vld [vmem:[%s3038_s1 + $0x550] sm:$0xff] }
 0x143   :  { %v2292_v38 = vadd.f32 %v438_v33, %v396_v35  ;;  %v1437_v33 = vld [vmem:[%s3038_s1 + $0x578] sm:$0xff]  ;;  %v1436_v35 = vld [vmem:[%s3038_s1 + $0x570] sm:$0xff] }
 0x144   :  { %v360_v39 = vpop.f32.mrf.mxu0  ;;  %v389_v0 = vpop.f32.mrf.mxu1  ;;  %769 = vmatpush.msra.mxu3 %v1437_v33 }
 0x145   :  { %v451_v40 = vmax.f32 %v2292_v38, 0.0  ;;  %v361_v41 = vadd.f32 %v360_v39, %v332_v28  ;;  %v1435_v28 = vld [vmem:[%s3038_s1 + $0x568] sm:$0xff]  ;;  %v1417_v39 = vld [vmem:[%s3038_s1 + $0x4d8] sm:$0xff]  ;;  %v1412_v38 = vld [vmem:[%s3038_s1 + $0x4b0] sm:$0xff] }
 0x146   :  { %770 = vmatpush.msra.mxu3 %v1436_v35 }
 0x147   :  { %v460_v44 = vrot.slane %v451_v40, 4  ;;  %v390_v1 = vadd.f32 %v389_v0, %v361_v41  ;;  %v334_v48 = vpop.f32.mrf.mxu3  ;;  %v1416_v0 = vld [vmem:[%s3038_s1 + $0x4d0] sm:$0xff]  ;;  %v1415_v41 = vld [vmem:[%s3038_s1 + $0x4c8] sm:$0xff] }
 0x148   :  { %v335_v56 = vadd.f32 %v2235_v3, %v334_v48  ;;  %771 = vmatpush.msra.mxu3 %v1435_v28  ;;  %v1448_v48 = vld [vmem:[%s3038_s1 + $0x5d0] sm:$0xff] }
 0x149   :  { %v397_v49 = vmax.f32 %v390_v1, 0.0  ;;  %v461_v50 = vsel %vm458_vm4, %v459_v27, %v460_v44  ;;  %v476_v8 = vrot.slane %v460_v44, 2  ;;  %v490_v9 = vrot.slane %v460_v44, 4  ;;  %v1421_v27 = vld [vmem:[%s3038_s1 + $0x4f8] sm:$0xff]  ;;  %v1411_v1 = vld [vmem:[%s3038_s1 + $0x4a8] sm:$0xff] }
 0x14a   :  { %v474_v52 = vrot.slane %v461_v50, 2  ;;  %v488_v53 = vrot.slane %v461_v50, 4  ;;  %571 = vmatmul.f32.gmra.mxu3 %v461_v50  ;;  %740 = vmatpush.msra.mxu2 %v1421_v27  ;;  %v1433_v44 = vld [vmem:[%s3038_s1 + $0x558] sm:$0xff] }
 0x14b   :  { %v2313_v57 = vadd.f32 %v441_v45, %v397_v49  ;;  %772 = vmatpush.msra.mxu3 %v1434_v43  ;;  %v1449_v45 = vld [vmem:[%s3038_s1 + $0x5d8] sm:$0xff]  ;;  %v1431_v49 = vld [vmem:[%s3038_s1 + $0x548] sm:$0xff] }
 0x14c   :  { %v363_v58 = vpop.f32.mrf.mxu0  ;;  %v475_v59 = vsel %vm55_vm1, %v473_v54, %v474_v52  ;;  %v489_v61 = vsel %vm458_vm4, %v487_v55, %v488_v53  ;;  %v392_v4 = vpop.f32.mrf.mxu1  ;;  %v477_v12 = vsel %vm55_vm1, %v474_v52, %v476_v8  ;;  %v491_v13 = vsel %vm458_vm4, %v488_v53, %v490_v9  ;;  %741 = vmatpush.msra.mxu2 %v1420_v31  ;;  %v1409_v50 = vld [vmem:[%s3038_s1 + $0x498] sm:$0xff]  ;;  %v1430_v52 = vld [vmem:[%s3038_s1 + $0x540] sm:$0xff]  ;;  %v1408_v53 = vld [vmem:[%s3038_s1 + $0x490] sm:$0xff] }
 0x14d   :  { %v452_v63 = vmax.f32 %v2313_v57, 0.0  ;;  %v364_v2 = vadd.f32 %v363_v58, %v335_v56  ;;  %597 = vmatmul.f32.vlgmr.msra.gmra.mxu0 %v475_v59  ;;  %626 = vmatmul.f32.vlgmr.msra.gmra.mxu1 %v489_v61  ;;  %v1446_v54 = vld [vmem:[%s3038_s1 + $0x5c0] sm:$0xff]  ;;  %v1429_v55 = vld [vmem:[%s3038_s1 + $0x538] sm:$0xff]  ;;  %v1407_v56 = vld [vmem:[%s3038_s1 + $0x488] sm:$0xff] }
 0x14e   :  { %742 = vmatpush.msra.mxu2 %v1419_v32  ;;  %773 = vmatpush.msra.mxu3 %v1433_v44  ;;  %v1445_v57 = vld [vmem:[%s3038_s1 + $0x5b8] sm:$0xff]  ;;  %v1428_v58 = vld [vmem:[%s3038_s1 + $0x530] sm:$0xff]  ;;  %v1406_v59 = vld [vmem:[%s3038_s1 + $0x480] sm:$0xff] }
 0x14f   :  { %v393_v5 = vadd.f32 %v392_v4, %v364_v2  ;;  %v462_v3 = vrot.slane %v452_v63, 4  ;;  %v1444_v61 = vld [vmem:[%s3038_s1 + $0x5b0] sm:$0xff]  ;;  %v1426_v2 = vld [vmem:[%s3038_s1 + $0x520] sm:$0xff]  ;;  %v1423_v9 = vld [vmem:[%s3038_s1 + $0x508] sm:$0xff] }
 0x150   :  { %743 = vmatpush.msra.mxu2 %v1418_v37  ;;  %774 = vmatpush.msra.mxu3 %v1432_v46  ;;  %v1442_v4 = vld [vmem:[%s3038_s1 + $0x5a0] sm:$0xff]  ;;  %v1440_v8 = vld [vmem:[%s3038_s1 + $0x590] sm:$0xff] }
 0x151   :  { %v398_v10 = vmax.f32 %v393_v5, 0.0  ;;  %v470_v7 = vsel %vm458_vm4, 0.0, %v462_v3  ;;  %v1425_v5 = vld [vmem:[%s3038_s1 + $0x518] sm:$0xff] }
 0x152   :  { %1405 = vmatmul.msk.f32.gmra.mxu3 %vm2276_vm5, %v462_v3  ;;  %v478_v18 = vrot.slane %v470_v7, 2  ;;  %v492_v19 = vrot.slane %v470_v7, 4  ;;  %744 = vmatpush.msra.mxu2 %v1417_v39 }
 0x153   :  { %v449_v11 = vadd.f32 %v444_v6, %v398_v10  ;;  %775 = vmatpush.msra.mxu3 %v1431_v49  ;;  %v1441_v6 = vld [vmem:[%s3038_s1 + $0x598] sm:$0xff]  ;;  %v1439_v10 = vld [vmem:[%s3038_s1 + $0x588] sm:$0xff] }
 0x154   :  { %745 = vmatpush.msra.mxu2 %v1416_v0  ;;  %v1489_v49 = vld [vmem:[%s3038_s1 + $0x678] sm:$0xff] }
 0x155   :  { %v453_v14 = vmax.f32 %v449_v11, 0.0  ;;  %600 = vmatmul.f32.gmra.mxu0 %v477_v12  ;;  %629 = vmatmul.f32.gmra.mxu1 %v491_v13  ;;  %v1422_v11 = vld [vmem:[%s3038_s1 + $0x500] sm:$0xff] }
 0x156   :  { %746 = vmatpush.msra.mxu2 %v1415_v41  ;;  %776 = vmatpush.msra.mxu3 %v1430_v52  ;;  %v1438_v12 = vld [vmem:[%s3038_s1 + $0x580] sm:$0xff] }
 0x157   :  { %v463_v15 = vrot.slane %v453_v14, 4 }
 0x158   :  { %747 = vmatpush.msra.mxu2 %v1414_v42  ;;  %777 = vmatpush.msra.mxu3 %v1429_v55 }
 0x159   :  { %v464_v60 = vsel %vm458_vm4, %v462_v3, %v463_v15  ;;  %v481_v23 = vrot.slane %v463_v15, 2  ;;  %v495_v25 = vrot.slane %v463_v15, 4  ;;  %v1424_v3 = vld [vmem:[%s3038_s1 + $0x510] sm:$0xff] }
 0x15a   :  { %v479_v16 = vrot.slane %v464_v60, 2  ;;  %v493_v17 = vrot.slane %v464_v60, 4  ;;  %577 = vmatmul.f32.gmra.mxu3 %v464_v60  ;;  %748 = vmatpush.msra.mxu2 %v1413_v21 }
 0x15b   :  { %778 = vmatpush.msra.mxu3 %v1428_v58 }
 0x15c   :  { %v480_v20 = vsel %vm55_vm1, %v478_v18, %v479_v16  ;;  %v494_v22 = vsel %vm458_vm4, %v492_v19, %v493_v17  ;;  %v482_v26 = vsel %vm55_vm1, %v479_v16, %v481_v23  ;;  %v496_v29 = vsel %vm458_vm4, %v493_v17, %v495_v25  ;;  %749 = vmatpush.msra.mxu2 %v1412_v38 }
 0x15d   :  { %603 = vmatmul.f32.gmra.mxu0 %v480_v20  ;;  %632 = vmatmul.f32.gmra.mxu1 %v494_v22 }
 0x15e   :  { %750 = vmatpush.msra.mxu2 %v1411_v1  ;;  %779 = vmatpush.msra.mxu3 %v1427_v62  ;;  %v1503_v62 = vld [vmem:[%s3038_s1 + $0x6e8] sm:$0xff] }
 0x160   :  { %751 = vmatpush.msra.mxu2 %v1410_v47  ;;  %780 = vmatpush.msra.mxu3 %v1426_v2 }
 0x162   :  { %752 = vmatpush.msra.mxu2 %v1409_v50  ;;  %781 = vmatpush.msra.mxu3 %v1425_v5  ;;  %v1486_v5 = vld [vmem:[%s3038_s1 + $0x660] sm:$0xff] }
 0x164   :  { %753 = vmatpush.msra.mxu2 %v1408_v53  ;;  %782 = vmatpush.msra.mxu3 %v1424_v3  ;;  %v1488_v53 = vld [vmem:[%s3038_s1 + $0x670] sm:$0xff] }
 0x165   :  { %606 = vmatmul.f32.gmra.mxu0 %v482_v26  ;;  %635 = vmatmul.f32.gmra.mxu1 %v496_v29 }
 0x166   :  { %754 = vmatpush.msra.mxu2 %v1407_v56  ;;  %783 = vmatpush.msra.mxu3 %v1423_v9 }
 0x168   :  { %755 = vmatpush.msra.mxu2 %v1406_v59  ;;  %784 = vmatpush.msra.mxu3 %v1422_v11  ;;  %v1487_v59 = vld [vmem:[%s3038_s1 + $0x668] sm:$0xff]  ;;  %v1485_v11 = vld [vmem:[%s3038_s1 + $0x658] sm:$0xff] }
 0x16a   :  { %956 = vmatpush.msrb.mxu2 %v1489_v49  ;;  %v1506_v49 = vld [vmem:[%s3038_s1 + $0x700] sm:$0xff] }
 0x16c   :  { %957 = vmatpush.msrb.mxu2 %v1488_v53  ;;  %v2654_v53 = vld [vmem:[%s3041_s2 + $0x170] sm:$0xff] }
 0x16d   :  { %866 = vmatmul.f32.vlgmr.msrb.gmra.mxu1 %v450_v24  ;;  %v1451_v24 = vld [vmem:[%s3038_s1 + $0x5e8] sm:$0xff] }
 0x16e   :  { %800 = vmatpush.msrb.mxu0 %v1451_v24  ;;  %958 = vmatpush.msrb.mxu2 %v1487_v59  ;;  %v2690_v59 = vld [vmem:[%s3041_s2 + $0x140] sm:$0xff] }
 0x170   :  { %959 = vmatpush.msrb.mxu2 %v1486_v5  ;;  %v2712_v5 = vld [vmem:[%s3041_s2 + $0x128] sm:$0xff] }
 0x172   :  { %960 = vmatpush.msrb.mxu2 %v1485_v11 }
 0x175   :  { %869 = vmatmul.f32.gmra.mxu1 %v451_v40  ;;  %v1450_v40 = vld [vmem:[%s3038_s1 + $0x5e0] sm:$0xff] }
 0x176   :  { %801 = vmatpush.msrb.mxu0 %v1450_v40 }
 0x178   :  { %802 = vmatpush.msrb.mxu0 %v1449_v45 }
 0x17a   :  { %803 = vmatpush.msrb.mxu0 %v1448_v48 }
 0x17c   :  { %804 = vmatpush.msrb.mxu0 %v1447_v51  ;;  %v1521_v51 = vld [vmem:[%s3038_s1 + $0x778] sm:$0xff] }
 0x17d   :  { %872 = vmatmul.f32.gmra.mxu1 %v452_v63  ;;  %v1443_v63 = vld [vmem:[%s3038_s1 + $0x5a8] sm:$0xff] }
 0x17e   :  { %805 = vmatpush.msrb.mxu0 %v1446_v54  ;;  %v1505_v54 = vld [vmem:[%s3038_s1 + $0x6f8] sm:$0xff] }
 0x17f   :  { %985 = vmatpush.msrb.mxu3 %v1505_v54  ;;  %v2660_v54 = vld [vmem:[%s3041_s2 + $0x168] sm:$0xff] }
 0x180   :  { %806 = vmatpush.msrb.mxu0 %v1445_v57  ;;  %v1504_v57 = vld [vmem:[%s3038_s1 + $0x6f0] sm:$0xff] }
 0x181   :  { %986 = vmatpush.msrb.mxu3 %v1504_v57  ;;  %v2678_v57 = vld [vmem:[%s3041_s2 + $0x150] sm:$0xff] }
 0x182   :  { %807 = vmatpush.msrb.mxu0 %v1444_v61  ;;  %v1519_v61 = vld [vmem:[%s3038_s1 + $0x768] sm:$0xff] }
 0x183   :  { %987 = vmatpush.msrb.mxu3 %v1503_v62  ;;  %v2695_v62 = vld [vmem:[%s3040_s3 + $0x4] ss:$0 sm:$0xff] }
 0x184   :  { %808 = vmatpush.msrb.mxu0 %v1443_v63 }
 0x185   :  { %875 = vmatmul.f32.gmra.mxu1 %v453_v14  ;;  %v1638_v14 = vld [vmem:[%s3040_s3 + $0x3] ss:$0 sm:$0xff] }
 0x186   :  { %809 = vmatpush.msrb.mxu0 %v1442_v4  ;;  %v1518_v4 = vld [vmem:[%s3038_s1 + $0x760] sm:$0xff] }
 0x188   :  { %810 = vmatpush.msrb.mxu0 %v1441_v6 }
 0x18a   :  { %811 = vmatpush.msrb.mxu0 %v1440_v8 }
 0x18c   :  { %812 = vmatpush.msrb.mxu0 %v1439_v10 }
 0x18e   :  { %813 = vmatpush.msrb.mxu0 %v1438_v12 }
 0x190   :  { %1014 = vmatpush.msra.mxu0 %v1521_v51  ;;  %v2645_v51 = vld [vmem:[%s3041_s2 + $0x178] sm:$0xff] }
 0x192   :  { %1015 = vmatpush.msra.mxu0 %v1520_v30  ;;  %v2666_v30 = vld [vmem:[%s3041_s2 + $0x160] sm:$0xff] }
 0x194   :  { %1016 = vmatpush.msra.mxu0 %v1519_v61 }
 0x196   :  { %1017 = vmatpush.msra.mxu0 %v1518_v4  ;;  %v2707_v4 = vld [vmem:[%s3041_s2 + $0x130] sm:$0xff] }
 0x1c4   :  { %v569_v13 = vpop.f32.mrf.mxu3 }
 0x1c5   :  { %v570_v15 = vadd.f32 %v1638_v14, %v569_v13 }
 0x1ca   :  { %v598_v7 = vpop.f32.mrf.mxu0  ;;  %v627_v60 = vpop.f32.mrf.mxu1 }
 0x1cb   :  { %v599_v16 = vadd.f32 %v598_v7, %v570_v15  ;;  %v1483_v15 = vld [vmem:[%s3038_s1 + $0x648] sm:$0xff] }
 0x1cd   :  { %v628_v17 = vadd.f32 %v627_v60, %v599_v16  ;;  %v572_v18 = vpop.f32.mrf.mxu3  ;;  %v1482_v16 = vld [vmem:[%s3038_s1 + $0x640] sm:$0xff] }
 0x1ce   :  { %v573_v22 = vadd.f32 %v1638_v14, %v572_v18 }
 0x1cf   :  { %v639_v19 = vmax.f32 %v628_v17, 0.0 }
 0x1d1   :  { %v647_v20 = vrot.slane %v639_v19, 4  ;;  %v1481_v19 = vld [vmem:[%s3038_s1 + $0x638] sm:$0xff] }
 0x1d2   :  { %v601_v23 = vpop.f32.mrf.mxu0  ;;  %v630_v25 = vpop.f32.mrf.mxu1 }
 0x1d3   :  { %v602_v26 = vadd.f32 %v601_v23, %v573_v22  ;;  %1455 = vmatmul.msk.f32.vlgmr.msra.gmra.mxu2 %vm2276_vm5, %v647_v20  ;;  %v657_v32 = vsel %vm458_vm4, 0.0, %v647_v20  ;;  %v1502_v22 = vld [vmem:[%s3038_s1 + $0x6e0] sm:$0xff]  ;;  %v1480_v23 = vld [vmem:[%s3038_s1 + $0x630] sm:$0xff] }
 0x1d4   :  { %v661_v39 = vrot.slane %v657_v32, 2  ;;  %v675_v0 = vrot.slane %v657_v32, 4  ;;  %988 = vmatpush.msrb.mxu3 %v1502_v22  ;;  %v1478_v32 = vld [vmem:[%s3038_s1 + $0x620] sm:$0xff] }
 0x1d5   :  { %v631_v29 = vadd.f32 %v630_v25, %v602_v26  ;;  %v575_v27 = vpop.f32.mrf.mxu3  ;;  %v1501_v25 = vld [vmem:[%s3038_s1 + $0x6d8] sm:$0xff]  ;;  %v1516_v26 = vld [vmem:[%s3038_s1 + $0x750] sm:$0xff] }
 0x1d6   :  { %v576_v34 = vadd.f32 %v1638_v14, %v575_v27  ;;  %v1500_v27 = vld [vmem:[%s3038_s1 + $0x6d0] sm:$0xff]  ;;  %989 = vmatpush.msrb.mxu3 %v1501_v25 }
 0x1d7   :  { %v640_v31 = vmax.f32 %v631_v29, 0.0  ;;  %v1479_v29 = vld [vmem:[%s3038_s1 + $0x628] sm:$0xff] }
 0x1d8   :  { %990 = vmatpush.msrb.mxu3 %v1500_v27 }
 0x1d9   :  { %v648_v33 = vrot.slane %v640_v31, 4  ;;  %v1515_v31 = vld [vmem:[%s3038_s1 + $0x748] sm:$0xff] }
 0x1da   :  { %v604_v35 = vpop.f32.mrf.mxu0  ;;  %v633_v36 = vpop.f32.mrf.mxu1 }
 0x1db   :  { %v605_v37 = vadd.f32 %v604_v35, %v576_v34  ;;  %v649_v28 = vsel %vm458_vm4, %v647_v20, %v648_v33  ;;  %v664_v46 = vrot.slane %v648_v33, 2  ;;  %v678_v47 = vrot.slane %v648_v33, 4  ;;  %v1517_v20 = vld [vmem:[%s3038_s1 + $0x758] sm:$0xff]  ;;  %v1499_v33 = vld [vmem:[%s3038_s1 + $0x6c8] sm:$0xff]  ;;  %v1514_v34 = vld [vmem:[%s3038_s1 + $0x740] sm:$0xff] }
 0x1dc   :  { %v662_v41 = vrot.slane %v649_v28, 2  ;;  %v676_v42 = vrot.slane %v649_v28, 4  ;;  %759 = vmatmul.f32.gmra.mxu2 %v649_v28  ;;  %1018 = vmatpush.msra.mxu0 %v1517_v20  ;;  %v1477_v35 = vld [vmem:[%s3038_s1 + $0x618] sm:$0xff]  ;;  %v1476_v28 = vld [vmem:[%s3038_s1 + $0x610] sm:$0xff] }
 0x1dd   :  { %v634_v21 = vadd.f32 %v633_v36, %v605_v37  ;;  %v578_v24 = vpop.f32.mrf.mxu3  ;;  %v1498_v36 = vld [vmem:[%s3038_s1 + $0x6c0] sm:$0xff]  ;;  %v1513_v37 = vld [vmem:[%s3038_s1 + $0x738] sm:$0xff]  ;;  %991 = vmatpush.msrb.mxu3 %v1499_v33  ;;  %v1536_v33 = vld [vmem:[%s3038_s1 + $0x7f0] sm:$0xff] }
 0x1de   :  { %v663_v43 = vsel %vm55_vm1, %v661_v39, %v662_v41  ;;  %v677_v38 = vsel %vm458_vm4, %v675_v0, %v676_v42  ;;  %v579_v1 = vadd.f32 %v1638_v14, %v578_v24  ;;  %v665_v55 = vsel %vm55_vm1, %v662_v41, %v664_v46  ;;  %v1484_v14 = vld [vmem:[%s3038_s1 + $0x650] sm:$0xff]  ;;  %1019 = vmatpush.msra.mxu0 %v1516_v26  ;;  %v1497_v39 = vld [vmem:[%s3038_s1 + $0x6b8] sm:$0xff]  ;;  %v1475_v41 = vld [vmem:[%s3038_s1 + $0x608] sm:$0xff] }
 0x1df   :  { %v641_v40 = vmax.f32 %v634_v21, 0.0  ;;  %785 = vmatmul.f32.vlgmr.msra.gmra.mxu3 %v663_v43  ;;  %814 = vmatmul.f32.vlgmr.msrb.gmra.mxu0 %v677_v38  ;;  %v679_v56 = vsel %vm458_vm4, %v676_v42, %v678_v47  ;;  %v1512_v0 = vld [vmem:[%s3038_s1 + $0x730] sm:$0xff]  ;;  %v1511_v42 = vld [vmem:[%s3038_s1 + $0x728] sm:$0xff]  ;;  %v1474_v24 = vld [vmem:[%s3038_s1 + $0x600] sm:$0xff] }
 0x1e0   :  { %961 = vmatpush.msrb.mxu2 %v1484_v14  ;;  %1020 = vmatpush.msra.mxu0 %v1515_v31  ;;  %v1496_v21 = vld [vmem:[%s3038_s1 + $0x6b0] sm:$0xff]  ;;  %v1510_v43 = vld [vmem:[%s3038_s1 + $0x720] sm:$0xff]  ;;  %v1495_v38 = vld [vmem:[%s3038_s1 + $0x6a8] sm:$0xff] }
 0x1e1   :  { %v650_v44 = vrot.slane %v641_v40, 4  ;;  %992 = vmatpush.msrb.mxu3 %v1498_v36  ;;  %v1645_v40 = vmov 0.0   ;;  %v1493_v46 = vld [vmem:[%s3038_s1 + $0x698] sm:$0xff]  ;;  %v1507_v47 = vld [vmem:[%s3038_s1 + $0x708] sm:$0xff]  ;;  %v2756_v26 = vld [vmem:[%s3041_s2 + $0x100] sm:$0xff] }
 0x1e2   :  { %v607_v45 = vpop.f32.mrf.mxu0  ;;  %v636_v50 = vpop.f32.mrf.mxu1  ;;  %962 = vmatpush.msrb.mxu2 %v1483_v15  ;;  %1021 = vmatpush.msra.mxu0 %v1514_v34  ;;  %v2750_v25 = vrot.slane %v1645_v40, 4  ;;  %v1569_v34 = vld [vmem:[%s3038_s1 + $0x8f8] sm:$0xff] }
 0x1e3   :  { %v608_v48 = vadd.f32 %v607_v45, %v579_v1  ;;  %v658_v2 = vsel %vm458_vm4, 0.0, %v650_v44  ;;  %993 = vmatpush.msrb.mxu3 %v1497_v39  ;;  %v1494_v1 = vld [vmem:[%s3038_s1 + $0x6a0] sm:$0xff]  ;;  %v1508_v45 = vld [vmem:[%s3038_s1 + $0x710] sm:$0xff]  ;;  %v1553_v39 = vld [vmem:[%s3038_s1 + $0x878] sm:$0xff] }
 0x1e4   :  { %1457 = vmatmul.msk.f32.gmra.mxu2 %vm2276_vm5, %v650_v44  ;;  %v666_v9 = vrot.slane %v658_v2, 2  ;;  %v680_v10 = vrot.slane %v658_v2, 4  ;;  %1022 = vmatpush.msra.mxu0 %v1513_v37  ;;  %v2701_v2 = vld [vmem:[%s3041_s2 + $0x138] sm:$0xff] }
 0x1e5   :  { %v637_v52 = vadd.f32 %v636_v50, %v608_v48  ;;  %963 = vmatpush.msrb.mxu2 %v1482_v16  ;;  %994 = vmatpush.msrb.mxu3 %v1496_v21  ;;  %v1492_v48 = vld [vmem:[%s3038_s1 + $0x690] sm:$0xff]  ;;  %v1491_v50 = vld [vmem:[%s3038_s1 + $0x688] sm:$0xff] }
 0x1e6   :  { %1023 = vmatpush.msra.mxu0 %v1512_v0  ;;  %v2738_v16 = vld [vmem:[%s3041_s2 + $0x110] sm:$0xff] }
 0x1e7   :  { %v642_v58 = vmax.f32 %v637_v52, 0.0  ;;  %788 = vmatmul.f32.gmra.mxu3 %v665_v55  ;;  %817 = vmatmul.f32.gmra.mxu0 %v679_v56  ;;  %v1490_v52 = vld [vmem:[%s3038_s1 + $0x680] sm:$0xff]  ;;  %v2672_v55 = vld [vmem:[%s3041_s2 + $0x158] sm:$0xff]  ;;  %v1568_v0 = vld [vmem:[%s3038_s1 + $0x8f0] sm:$0xff] }
 0x1e8   :  { %964 = vmatpush.msrb.mxu2 %v1481_v19  ;;  %1024 = vmatpush.msra.mxu0 %v1511_v42  ;;  %v1567_v42 = vld [vmem:[%s3038_s1 + $0x8e8] sm:$0xff] }
 0x1e9   :  { %v651_v63 = vrot.slane %v642_v58, 4  ;;  %995 = vmatpush.msrb.mxu3 %v1495_v38  ;;  %v2684_v58 = vld [vmem:[%s3041_s2 + $0x148] sm:$0xff]  ;;  %v1534_v38 = vld [vmem:[%s3038_s1 + $0x7e0] sm:$0xff] }
 0x1ea   :  { %965 = vmatpush.msrb.mxu2 %v1480_v23  ;;  %1025 = vmatpush.msra.mxu0 %v1510_v43  ;;  %v867_v61 = vpop.f32.mrf.mxu1 }
 0x1eb   :  { %v652_v6 = vsel %vm458_vm4, %v650_v44, %v651_v63  ;;  %v669_v7 = vrot.slane %v651_v63, 2  ;;  %v683_v60 = vrot.slane %v651_v63, 4  ;;  %v1509_v44 = vld [vmem:[%s3038_s1 + $0x718] sm:$0xff]  ;;  %996 = vmatpush.msrb.mxu3 %v1494_v1 }
 0x1ec   :  { %v667_v3 = vrot.slane %v652_v6, 2  ;;  %v681_v8 = vrot.slane %v652_v6, 4  ;;  %765 = vmatmul.f32.gmra.mxu2 %v652_v6  ;;  %1026 = vmatpush.msra.mxu0 %v1509_v44 }
 0x1ed   :  { %966 = vmatpush.msrb.mxu2 %v1479_v29  ;;  %997 = vmatpush.msrb.mxu3 %v1493_v46 }
 0x1ee   :  { %v668_v12 = vsel %vm55_vm1, %v666_v9, %v667_v3  ;;  %v682_v13 = vsel %vm458_vm4, %v680_v10, %v681_v8  ;;  %v670_v17 = vsel %vm55_vm1, %v667_v3, %v669_v7  ;;  %v684_v18 = vsel %vm458_vm4, %v681_v8, %v683_v60  ;;  %1027 = vmatpush.msra.mxu0 %v1508_v45  ;;  %v2719_v9 = vld [vmem:[%s3041_s2 + $0x120] sm:$0xff] }
 0x1ef   :  { %791 = vmatmul.f32.gmra.mxu3 %v668_v12  ;;  %820 = vmatmul.f32.gmra.mxu0 %v682_v13  ;;  %v2724_v10 = vld [vmem:[%s3040_s3 + $0x5] ss:$0 sm:$0xff]  ;;  %v2731_v13 = vld [vmem:[%s3041_s2 + $0x118] sm:$0xff] }
 0x1f0   :  { %967 = vmatpush.msrb.mxu2 %v1478_v32  ;;  %1028 = vmatpush.msra.mxu0 %v1507_v47  ;;  %v868_v14 = vadd.f32 %v2724_v10, %v867_v61  ;;  %v1537_v32 = vld [vmem:[%s3038_s1 + $0x7f8] sm:$0xff] }
 0x1f1   :  { %998 = vmatpush.msrb.mxu3 %v1492_v48  ;;  %1114 = vmatpush.msra.mxu1 %v1537_v32  ;;  %v1533_v47 = vld [vmem:[%s3038_s1 + $0x7d8] sm:$0xff]  ;;  %v1551_v48 = vld [vmem:[%s3038_s1 + $0x868] sm:$0xff] }
 0x1f2   :  { %968 = vmatpush.msrb.mxu2 %v1477_v35  ;;  %1029 = vmatpush.msra.mxu0 %v1506_v49  ;;  %v870_v15 = vpop.f32.mrf.mxu1  ;;  %v1566_v49 = vld [vmem:[%s3038_s1 + $0x8e0] sm:$0xff]  ;;  %v1563_v32 = vld [vmem:[%s3038_s1 + $0x8c8] sm:$0xff] }
 0x1f3   :  { %999 = vmatpush.msrb.mxu3 %v1491_v50  ;;  %v871_v35 = vadd.f32 %v2724_v10, %v870_v15  ;;  %1115 = vmatpush.msra.mxu1 %v1536_v33  ;;  %v1564_v15 = vld [vmem:[%s3038_s1 + $0x8d0] sm:$0xff] }
 0x1f4   :  { %969 = vmatpush.msrb.mxu2 %v1476_v28  ;;  %1216 = vmatpush.msrb.mxu0 %v2645_v51  ;;  %v1535_v28 = vld [vmem:[%s3038_s1 + $0x7e8] sm:$0xff] }
 0x1f5   :  { %1000 = vmatpush.msrb.mxu3 %v1490_v52  ;;  %1116 = vmatpush.msra.mxu1 %v1535_v28 }
 0x1f6   :  { %970 = vmatpush.msrb.mxu2 %v1475_v41  ;;  %1217 = vmatpush.msrb.mxu0 %v2654_v53  ;;  %v1552_v41 = vld [vmem:[%s3038_s1 + $0x870] sm:$0xff] }
 0x1f7   :  { %794 = vmatmul.f32.gmra.mxu3 %v670_v17  ;;  %823 = vmatmul.f32.gmra.mxu0 %v684_v18  ;;  %v2743_v17 = vld [vmem:[%s3041_s2 + $0x108] sm:$0xff] }
 0x1f8   :  { %971 = vmatpush.msrb.mxu2 %v1474_v24  ;;  %1218 = vmatpush.msrb.mxu0 %v2660_v54 }
 0x1f9   :  { %972 = vmatmul.f32.vlgmr.msrb.gmra.mxu2 %v1645_v40  ;;  %1168 = vmatpush.msra.mxu3 %v1569_v34 }
 0x1fa   :  { %1219 = vmatpush.msrb.mxu0 %v2666_v30  ;;  %v873_v21 = vpop.f32.mrf.mxu1  ;;  %1141 = vmatpush.msra.mxu2 %v1553_v39  ;;  %v1527_v39 = vld [vmem:[%s3038_s1 + $0x7a8] sm:$0xff] }
 0x1fb   :  { %1169 = vmatpush.msra.mxu3 %v1568_v0  ;;  %1117 = vmatpush.msra.mxu1 %v1534_v38  ;;  %v1525_v38 = vld [vmem:[%s3038_s1 + $0x798] sm:$0xff] }
 0x1fc   :  { %1220 = vmatpush.msrb.mxu0 %v2672_v55  ;;  %1142 = vmatpush.msra.mxu2 %v1552_v41 }
 0x1fd   :  { %1170 = vmatpush.msra.mxu3 %v1567_v42  ;;  %1118 = vmatpush.msra.mxu1 %v1533_v47  ;;  %v1560_v47 = vld [vmem:[%s3038_s1 + $0x8b0] sm:$0xff] }
 0x1fe   :  { %1221 = vmatpush.msrb.mxu0 %v2678_v57  ;;  %1143 = vmatpush.msra.mxu2 %v1551_v48  ;;  %v1523_v48 = vld [vmem:[%s3038_s1 + $0x788] sm:$0xff] }
 0x1ff   :  { %1171 = vmatpush.msra.mxu3 %v1566_v49  ;;  %v1544_v49 = vld [vmem:[%s3038_s1 + $0x830] sm:$0xff] }
 0x200   :  { %1222 = vmatpush.msrb.mxu0 %v2684_v58 }
 0x202   :  { %1223 = vmatpush.msrb.mxu0 %v2690_v59 }
 0x204   :  { %1224 = vmatpush.msrb.mxu0 %v2701_v2 }
 0x206   :  { %1225 = vmatpush.msrb.mxu0 %v2707_v4 }
 0x208   :  { %1226 = vmatpush.msrb.mxu0 %v2712_v5 }
 0x20a   :  { %1227 = vmatpush.msrb.mxu0 %v2719_v9 }
 0x20c   :  { %1228 = vmatpush.msrb.mxu0 %v2731_v13 }
 0x20e   :  { %1229 = vmatpush.msrb.mxu0 %v2738_v16 }
 0x210   :  { %1230 = vmatpush.msrb.mxu0 %v2743_v17 }
 0x212   :  { %1231 = vmatpush.msrb.mxu0 %v2756_v26 }
 0x256   :  { %v757_v56 = vpop.f32.mrf.mxu2 }
 0x257   :  { %v758_v6 = vadd.f32 %v2695_v62, %v757_v56  ;;  %v1532_v56 = vld [vmem:[%s3038_s1 + $0x7d0] sm:$0xff] }
 0x258   :  { %1119 = vmatpush.msra.mxu1 %v1532_v56  ;;  %v1543_v56 = vld [vmem:[%s3038_s1 + $0x828] sm:$0xff] }
 0x25c   :  { %v815_v63 = vpop.f32.mrf.mxu0 }
 0x25f   :  { %v760_v3 = vpop.f32.mrf.mxu2 }
 0x260   :  { %v761_v18 = vadd.f32 %v2695_v62, %v760_v3  ;;  %v874_v3 = vadd.f32 %v2724_v10, %v873_v21  ;;  %v1526_v21 = vld [vmem:[%s3038_s1 + $0x7a0] sm:$0xff] }
 0x262   :  { %v786_v8 = vpop.f32.mrf.mxu3 }
 0x263   :  { %v787_v11 = vadd.f32 %v786_v8, %v758_v6  ;;  %v1565_v6 = vld [vmem:[%s3038_s1 + $0x8d8] sm:$0xff] }
 0x264   :  { %v818_v60 = vpop.f32.mrf.mxu0  ;;  %1172 = vmatpush.msra.mxu3 %v1565_v6  ;;  %v1542_v6 = vld [vmem:[%s3038_s1 + $0x820] sm:$0xff] }
 0x265   :  { %v816_v12 = vadd.f32 %v815_v63, %v787_v11  ;;  %v1550_v63 = vld [vmem:[%s3038_s1 + $0x860] sm:$0xff] }
 0x266   :  { %1144 = vmatpush.msra.mxu2 %v1550_v63  ;;  %1173 = vmatpush.msra.mxu3 %v1564_v15  ;;  %v1557_v63 = vld [vmem:[%s3038_s1 + $0x898] sm:$0xff]  ;;  %v1539_v15 = vld [vmem:[%s3038_s1 + $0x808] sm:$0xff] }
 0x267   :  { %v827_v7 = vmax.f32 %v816_v12, 0.0  ;;  %v763_v29 = vpop.f32.mrf.mxu2  ;;  %v1531_v12 = vld [vmem:[%s3038_s1 + $0x7c8] sm:$0xff] }
 0x268   :  { %v764_v24 = vadd.f32 %v2695_v62, %v763_v29  ;;  %1120 = vmatpush.msra.mxu1 %v1531_v12  ;;  %v1529_v29 = vld [vmem:[%s3038_s1 + $0x7b8] sm:$0xff]  ;;  %1174 = vmatpush.msra.mxu3 %v1563_v32  ;;  %v1540_v12 = vld [vmem:[%s3038_s1 + $0x810] sm:$0xff] }
 0x269   :  { %v879_v19 = vadd.f32 %v868_v14, %v827_v7  ;;  %v1549_v14 = vld [vmem:[%s3038_s1 + $0x858] sm:$0xff] }
 0x26a   :  { %v789_v20 = vpop.f32.mrf.mxu3  ;;  %1145 = vmatpush.msra.mxu2 %v1549_v14  ;;  %v1554_v14 = vld [vmem:[%s3038_s1 + $0x880] sm:$0xff] }
 0x26b   :  { %v2747_v22 = vmax.f32 %v879_v19, 0.0  ;;  %v790_v23 = vadd.f32 %v789_v20, %v761_v18  ;;  %v1530_v18 = vld [vmem:[%s3038_s1 + $0x7c0] sm:$0xff] }
 0x26c   :  { %v821_v44 = vpop.f32.mrf.mxu0  ;;  %1121 = vmatpush.msra.mxu1 %v1530_v18 }
 0x26d   :  { %v819_v27 = vadd.f32 %v818_v60, %v790_v23  ;;  %975 = vmatmul.f32.gmra.mxu2 %v2747_v22  ;;  %1030 = vmatmul.f32.vlgmr.msra.gmra.mxu0 %v2747_v22  ;;  %v893_v31 = vrot.slane %v2747_v22, 4 }
 0x26e   :  { %1122 = vmatpush.msra.mxu1 %v1529_v29 }
 0x26f   :  { %v828_v36 = vmax.f32 %v819_v27, 0.0  ;;  %v894_v37 = vsel %vm458_vm4, %v2750_v25, %v893_v31  ;;  %v766_v61 = vpop.f32.mrf.mxu2  ;;  %v876_v27 = vpop.f32.mrf.mxu1 }
 0x270   :  { %1001 = vmatmul.f32.vlgmr.msrb.gmra.mxu3 %v894_v37  ;;  %v767_v7 = vadd.f32 %v2695_v62, %v766_v61  ;;  %v1548_v62 = vld [vmem:[%s3038_s1 + $0x850] sm:$0xff]  ;;  %v1558_v61 = vld [vmem:[%s3038_s1 + $0x8a0] sm:$0xff] }
 0x271   :  { %v880_v43 = vadd.f32 %v871_v35, %v828_v36  ;;  %v1528_v35 = vld [vmem:[%s3038_s1 + $0x7b0] sm:$0xff]  ;;  %1146 = vmatpush.msra.mxu2 %v1548_v62  ;;  %v877_v36 = vadd.f32 %v2724_v10, %v876_v27 }
 0x272   :  { %v792_v1 = vpop.f32.mrf.mxu3  ;;  %1123 = vmatpush.msra.mxu1 %v1528_v35 }
 0x273   :  { %v793_v45 = vadd.f32 %v792_v1, %v764_v24  ;;  %v2793_v46 = vmax.f32 %v880_v43, 0.0  ;;  %v1547_v24 = vld [vmem:[%s3038_s1 + $0x848] sm:$0xff]  ;;  %v1562_v43 = vld [vmem:[%s3038_s1 + $0x8c0] sm:$0xff]  ;;  %v1524_v1 = vld [vmem:[%s3038_s1 + $0x790] sm:$0xff] }
 0x274   :  { %1124 = vmatpush.msra.mxu1 %v1527_v39  ;;  %1147 = vmatpush.msra.mxu2 %v1547_v24 }
 0x275   :  { %v822_v50 = vadd.f32 %v821_v44, %v793_v45  ;;  %978 = vmatmul.f32.gmra.mxu2 %v1645_v40  ;;  %1033 = vmatmul.f32.gmra.mxu0 %v2793_v46  ;;  %v895_v52 = vrot.slane %v2793_v46, 4  ;;  %v1561_v44 = vld [vmem:[%s3038_s1 + $0x8b8] sm:$0xff] }
 0x276   :  { %1125 = vmatpush.msra.mxu1 %v1526_v21  ;;  %1175 = vmatpush.msra.mxu3 %v1562_v43  ;;  %v1545_v45 = vld [vmem:[%s3038_s1 + $0x838] sm:$0xff] }
 0x277   :  { %v829_v8 = vmax.f32 %v822_v50, 0.0  ;;  %v896_v11 = vsel %vm458_vm4, %v893_v31, %v895_v52  ;;  %v824_v31 = vpop.f32.mrf.mxu0  ;;  %v1559_v50 = vld [vmem:[%s3038_s1 + $0x8a8] sm:$0xff]  ;;  %v1522_v52 = vld [vmem:[%s3038_s1 + $0x780] sm:$0xff] }
 0x278   :  { %1004 = vmatmul.f32.gmra.mxu3 %v896_v11  ;;  %1126 = vmatpush.msra.mxu1 %v1525_v38  ;;  %v1555_v11 = vld [vmem:[%s3038_s1 + $0x888] sm:$0xff]  ;;  %v1601_v38 = vld [vmem:[%s3041_s2 + $0x1f8] sm:$0xff] }
 0x279   :  { %v881_v60 = vadd.f32 %v874_v3, %v829_v8  ;;  %1176 = vmatpush.msra.mxu3 %v1561_v44  ;;  %v1556_v3 = vld [vmem:[%s3038_s1 + $0x890] sm:$0xff]  ;;  %v1541_v8 = vld [vmem:[%s3038_s1 + $0x818] sm:$0xff]  ;;  %v1595_v44 = vld [vmem:[%s3041_s2 + $0x1c8] sm:$0xff] }
 0x27a   :  { %v795_v19 = vpop.f32.mrf.mxu3  ;;  %1127 = vmatpush.msra.mxu1 %v1524_v1 }
 0x27b   :  { %v2831_v20 = vmax.f32 %v881_v60, 0.0  ;;  %v796_v23 = vadd.f32 %v795_v19, %v767_v7  ;;  %1177 = vmatpush.msra.mxu3 %v1560_v47  ;;  %v1538_v7 = vld [vmem:[%s3038_s1 + $0x800] sm:$0xff]  ;;  %v1593_v47 = vld [vmem:[%s3041_s2 + $0x1b8] sm:$0xff] }
 0x27c   :  { %1128 = vmatpush.msra.mxu1 %v1523_v48 }
 0x27d   :  { %v825_v33 = vadd.f32 %v824_v31, %v796_v23  ;;  %981 = vmatmul.f32.gmra.mxu2 %v2831_v20  ;;  %1036 = vmatmul.f32.gmra.mxu0 %v2831_v20  ;;  %v897_v34 = vrot.slane %v2831_v20, 4 }
 0x27e   :  { %1178 = vmatpush.msra.mxu3 %v1559_v50  ;;  %1129 = vmatpush.msra.mxu1 %v1522_v52  ;;  %v1591_v52 = vld [vmem:[%s3041_s2 + $0x1a8] sm:$0xff] }
 0x27f   :  { %v830_v37 = vmax.f32 %v825_v33, 0.0  ;;  %v898_v28 = vsel %vm458_vm4, %v2750_v25, %v897_v34  ;;  %1130 = vmatmul.f32.vlgmr.msra.gmra.mxu1 %v1645_v40 }
 0x280   :  { %1007 = vmatmul.f32.gmra.mxu3 %v898_v28  ;;  %1273 = vmatpush.msrb.mxu1 %v1601_v38 }
 0x281   :  { %v882_v0 = vadd.f32 %v877_v36, %v830_v37  ;;  %1179 = vmatpush.msra.mxu3 %v1558_v61  ;;  %v1590_v61 = vld [vmem:[%s3041_s2 + $0x1a0] sm:$0xff] }
 0x283   :  { %v2854_v41 = vmax.f32 %v882_v0, 0.0  ;;  %1180 = vmatpush.msra.mxu3 %v1557_v63  ;;  %v1589_v63 = vld [vmem:[%s3041_s2 + $0x198] sm:$0xff] }
 0x285   :  { %1039 = vmatmul.f32.gmra.mxu0 %v2854_v41  ;;  %v899_v42 = vrot.slane %v2854_v41, 4  ;;  %1181 = vmatpush.msra.mxu3 %v1556_v3  ;;  %v1588_v3 = vld [vmem:[%s3041_s2 + $0x190] sm:$0xff] }
 0x287   :  { %v900_v10 = vsel %vm458_vm4, %v897_v34, %v899_v42  ;;  %1182 = vmatpush.msra.mxu3 %v1555_v11 }
 0x288   :  { %1010 = vmatmul.f32.gmra.mxu3 %v900_v10 }
 0x289   :  { %1183 = vmatpush.msra.mxu3 %v1554_v14 }
 0x28b   :  { %1603 = vmatpush.msrb.mxu3 %v2645_v51 }
 0x28d   :  { %1232 = vmatmul.f32.vlgmr.msrb.gmra.mxu0 %v2747_v22  ;;  %v1546_v22 = vld [vmem:[%s3038_s1 + $0x840] sm:$0xff]  ;;  %1605 = vmatpush.msrb.mxu3 %v2654_v53 }
 0x28e   :  { %1148 = vmatpush.msra.mxu2 %v1546_v22  ;;  %v1599_v22 = vld [vmem:[%s3041_s2 + $0x1e8] sm:$0xff] }
 0x28f   :  { %1607 = vmatpush.msrb.mxu3 %v2660_v54 }
 0x290   :  { %1149 = vmatpush.msra.mxu2 %v1545_v45  ;;  %v1594_v45 = vld [vmem:[%s3041_s2 + $0x1c0] sm:$0xff] }
 0x291   :  { %1609 = vmatpush.msrb.mxu3 %v2666_v30 }
 0x292   :  { %1150 = vmatpush.msra.mxu2 %v1544_v49  ;;  %v1592_v49 = vld [vmem:[%s3041_s2 + $0x1b0] sm:$0xff] }
 0x293   :  { %1611 = vmatpush.msrb.mxu3 %v2672_v55 }
 0x294   :  { %1151 = vmatpush.msra.mxu2 %v1543_v56 }
 0x295   :  { %1613 = vmatpush.msrb.mxu3 %v2678_v57 }
 0x296   :  { %1152 = vmatpush.msra.mxu2 %v1542_v6 }
 0x297   :  { %1615 = vmatpush.msrb.mxu3 %v2684_v58 }
 0x298   :  { %1153 = vmatpush.msra.mxu2 %v1541_v8  ;;  %v1587_v8 = vld [vmem:[%s3041_s2 + $0x188] sm:$0xff] }
 0x299   :  { %1617 = vmatpush.msrb.mxu3 %v2690_v59 }
 0x29a   :  { %1154 = vmatpush.msra.mxu2 %v1540_v12  ;;  %v1586_v12 = vld [vmem:[%s3041_s2 + $0x180] sm:$0xff] }
 0x29b   :  { %1619 = vmatpush.msrb.mxu3 %v2701_v2 }
 0x29c   :  { %1155 = vmatpush.msra.mxu2 %v1539_v15 }
 0x29d   :  { %1621 = vmatpush.msrb.mxu3 %v2707_v4 }
 0x29e   :  { %1156 = vmatpush.msra.mxu2 %v1538_v7  ;;  %v1642_v7 = vld [vmem:[%s3040_s3 + $0x7] ss:$0 sm:$0xff] }
 0x29f   :  { %1623 = vmatpush.msrb.mxu3 %v2712_v5 }
 0x2a0   :  { %1602 = vmatpush.msrb.mxu2 %v2645_v51  ;;  %v973_v51 = vpop.f32.mrf.mxu2 }
 0x2a1   :  { %1625 = vmatpush.msrb.mxu3 %v2719_v9 }
 0x2a2   :  { %1604 = vmatpush.msrb.mxu2 %v2654_v53 }
 0x2a3   :  { %1627 = vmatpush.msrb.mxu3 %v2731_v13 }
 0x2a4   :  { %1606 = vmatpush.msrb.mxu2 %v2660_v54  ;;  %v1641_v54 = vld [vmem:[%s3040_s3 + $0x6] ss:$0 sm:$0xff] }
 0x2a5   :  { %1629 = vmatpush.msrb.mxu3 %v2738_v16 }
 0x2a6   :  { %1608 = vmatpush.msrb.mxu2 %v2666_v30  ;;  %v974_v30 = vadd.f32 %v1641_v54, %v973_v51 }
 0x2a7   :  { %1631 = vmatpush.msrb.mxu3 %v2743_v17 }
 0x2a8   :  { %1610 = vmatpush.msrb.mxu2 %v2672_v55 }
 0x2a9   :  { %1633 = vmatpush.msrb.mxu3 %v2756_v26 }
 0x2aa   :  { %1612 = vmatpush.msrb.mxu2 %v2678_v57 }
 0x2ac   :  { %1614 = vmatpush.msrb.mxu2 %v2684_v58 }
 0x2ae   :  { %1616 = vmatpush.msrb.mxu2 %v2690_v59 }
 0x2b0   :  { %1618 = vmatpush.msrb.mxu2 %v2701_v2 }
 0x2b2   :  { %1620 = vmatpush.msrb.mxu2 %v2707_v4 }
 0x2b4   :  { %1622 = vmatpush.msrb.mxu2 %v2712_v5 }
 0x2b6   :  { %1624 = vmatpush.msrb.mxu2 %v2719_v9 }
 0x2b8   :  { %1626 = vmatpush.msrb.mxu2 %v2731_v13 }
 0x2ba   :  { %1628 = vmatpush.msrb.mxu2 %v2738_v16 }
 0x2bc   :  { %1630 = vmatpush.msrb.mxu2 %v2743_v17 }
 0x2be   :  { %1632 = vmatpush.msrb.mxu2 %v2756_v26 }
 0x2ea   :  { %v1031_v53 = vpop.f32.mrf.mxu0 }
 0x2f0   :  { %v976_v57 = vpop.f32.mrf.mxu2 }
 0x2f1   :  { %v977_v4 = vadd.f32 %v1641_v54, %v976_v57 }
 0x2f2   :  { %v1034_v55 = vpop.f32.mrf.mxu0 }
 0x2f3   :  { %v1002_v58 = vpop.f32.mrf.mxu3 }
 0x2f4   :  { %v1003_v60 = vadd.f32 %v1002_v58, %v974_v30 }
 0x2f6   :  { %v1032_v59 = vadd.f32 %v1031_v53, %v1003_v60  ;;  %v1643_v60 = vld [vmem:[%s3040_s3 + $0x8] ss:$0 sm:$0xff] }
 0x2f8   :  { %v1043_v2 = vmax.f32 %v1032_v59, 0.0  ;;  %v979_v23 = vpop.f32.mrf.mxu2 }
 0x2f9   :  { %v980_v16 = vadd.f32 %v1641_v54, %v979_v23 }
 0x2fa   :  { %v1051_v5 = vrot.slane %v1043_v2, 4  ;;  %v1037_v18 = vpop.f32.mrf.mxu0  ;;  %1132 = vmatmul.f32.gmra.mxu1 %v1043_v2  ;;  %1184 = vmatmul.f32.vlgmr.msra.gmra.mxu3 %v1043_v2 }
 0x2fb   :  { %v1005_v19 = vpop.f32.mrf.mxu3 }
 0x2fc   :  { %v1006_v9 = vadd.f32 %v1005_v19, %v977_v4  ;;  %v1052_v13 = vsel %vm458_vm4, %v2750_v25, %v1051_v5  ;;  %v1131_v43 = vpop.f32.mrf.mxu1 }
 0x2fd   :  { %1157 = vmatmul.f32.vlgmr.msra.gmra.mxu2 %v1052_v13 }
 0x2fe   :  { %v1035_v29 = vadd.f32 %v1034_v55, %v1006_v9 }
 0x300   :  { %v1044_v62 = vmax.f32 %v1035_v29, 0.0  ;;  %v982_v35 = vpop.f32.mrf.mxu2 }
 0x301   :  { %v983_v37 = vadd.f32 %v1641_v54, %v982_v35 }
 0x302   :  { %v1040_v27 = vpop.f32.mrf.mxu0  ;;  %1135 = vmatmul.f32.gmra.mxu1 %v1645_v40  ;;  %v1053_v31 = vrot.slane %v1044_v62, 4  ;;  %1186 = vmatmul.f32.gmra.mxu3 %v1044_v62 }
 0x303   :  { %v1008_v32 = vpop.f32.mrf.mxu3 }
 0x304   :  { %v1009_v17 = vadd.f32 %v1008_v32, %v980_v16  ;;  %v1054_v33 = vsel %vm458_vm4, %v1051_v5, %v1053_v31 }
 0x305   :  { %1159 = vmatmul.f32.gmra.mxu2 %v1054_v33  ;;  %v1644_v33 = vld [vmem:[%s3040_s3 + $0x9] ss:$0 sm:$0xff] }
 0x306   :  { %v1038_v34 = vadd.f32 %v1037_v18, %v1009_v17 }
 0x308   :  { %v1045_v36 = vmax.f32 %v1038_v34, 0.0 }
 0x30a   :  { %1137 = vmatmul.f32.gmra.mxu1 %v1045_v36  ;;  %1189 = vmatmul.f32.gmra.mxu3 %v1045_v36  ;;  %v1233_v28 = vpop.f32.mrf.mxu0  ;;  %v1055_v26 = vrot.slane %v1045_v36, 4 }
 0x30b   :  { %v1011_v39 = vpop.f32.mrf.mxu3 }
 0x30c   :  { %v1012_v0 = vadd.f32 %v1011_v39, %v983_v37  ;;  %v1056_v40 = vsel %vm458_vm4, %v2750_v25, %v1055_v26  ;;  %v1600_v25 = vld [vmem:[%s3041_s2 + $0x1f0] sm:$0xff] }
 0x30d   :  { %1162 = vmatmul.f32.gmra.mxu2 %v1056_v40  ;;  %1274 = vmatpush.msrb.mxu1 %v1600_v25 }
 0x30e   :  { %v1041_v42 = vadd.f32 %v1040_v27, %v1012_v0 }
 0x30f   :  { %1275 = vmatpush.msrb.mxu1 %v1599_v22 }
 0x310   :  { %v1046_v10 = vmax.f32 %v1041_v42, 0.0 }
 0x312   :  { %v1057_v21 = vrot.slane %v1046_v10, 4  ;;  %1191 = vmatmul.f32.gmra.mxu3 %v1046_v10 }
 0x314   :  { %v1058_v24 = vsel %vm458_vm4, %v1055_v26, %v1057_v21 }
 0x315   :  { %1164 = vmatmul.f32.gmra.mxu2 %v1058_v24 }
 0x31a   :  { %1239 = vmatmul.f32.vlgmr.msrb.gmra.mxu3 %v2854_v41  ;;  %v1596_v41 = vld [vmem:[%s3041_s2 + $0x1d0] sm:$0xff] }
 0x31d   :  { %1234 = vmatmul.f32.vlgmr.msrb.gmra.mxu2 %v2793_v46  ;;  %v1598_v46 = vld [vmem:[%s3041_s2 + $0x1e0] sm:$0xff] }
 0x31e   :  { %1276 = vmatpush.msrb.mxu1 %v1598_v46 }
 0x325   :  { %1237 = vmatmul.f32.gmra.mxu2 %v2831_v20  ;;  %v1597_v20 = vld [vmem:[%s3041_s2 + $0x1d8] sm:$0xff] }
 0x326   :  { %1277 = vmatpush.msrb.mxu1 %v1597_v20 }
 0x328   :  { %1278 = vmatpush.msrb.mxu1 %v1596_v41 }
 0x32a   :  { %1279 = vmatpush.msrb.mxu1 %v1595_v44 }
 0x32c   :  { %1280 = vmatpush.msrb.mxu1 %v1594_v45 }
 0x32e   :  { %1281 = vmatpush.msrb.mxu1 %v1593_v47 }
 0x330   :  { %1282 = vmatpush.msrb.mxu1 %v1592_v49 }
 0x332   :  { %1283 = vmatpush.msrb.mxu1 %v1591_v52 }
 0x334   :  { %1284 = vmatpush.msrb.mxu1 %v1590_v61 }
 0x336   :  { %1285 = vmatpush.msrb.mxu1 %v1589_v63 }
 0x338   :  { %1286 = vmatpush.msrb.mxu1 %v1588_v3 }
 0x33a   :  { %1287 = vmatpush.msrb.mxu1 %v1587_v8 }
 0x33c   :  { %1288 = vmatpush.msrb.mxu1 %v1586_v12 }
 0x377   :  { %v1133_v1 = vpop.f32.mrf.mxu1 }
 0x378   :  { %v1134_v54 = vadd.f32 %v1642_v7, %v1133_v1 }
 0x37d   :  { %v1185_v48 = vpop.f32.mrf.mxu3 }
 0x37f   :  { %v1136_v50 = vpop.f32.mrf.mxu1 }
 0x380   :  { %v1158_v56 = vpop.f32.mrf.mxu2 }
 0x385   :  { %v1187_v6 = vpop.f32.mrf.mxu3 }
 0x387   :  { %v1138_v51 = vpop.f32.mrf.mxu1 }
 0x388   :  { %v1160_v11 = vpop.f32.mrf.mxu2  ;;  %v1139_v30 = vadd.f32 %v1642_v7, %v1138_v51 }
 0x389   :  { %v1161_v57 = vadd.f32 %v1160_v11, %v1134_v54 }
 0x38b   :  { %v1188_v2 = vadd.f32 %v1187_v6, %v1161_v57 }
 0x38d   :  { %v1190_v14 = vpop.f32.mrf.mxu3  ;;  %v1195_v13 = vmax.f32 %v1188_v2, 0.0 }
 0x390   :  { %v1163_v15 = vpop.f32.mrf.mxu2 }
 0x395   :  { %v1192_v53 = vpop.f32.mrf.mxu3 }
 0x398   :  { %v1165_v55 = vpop.f32.mrf.mxu2 }
 0x399   :  { %v1166_v58 = vadd.f32 %v1165_v55, %v1139_v30 }
 0x39b   :  { %v1193_v59 = vadd.f32 %v1192_v53, %v1166_v58 }
 0x39d   :  { %v1196_v4 = vmax.f32 %v1193_v59, 0.0  ;;  %v1240_v5 = vpop.f32.mrf.mxu3 }
 0x39e   :  { %v1241_v18 = vadd.f32 %v1643_v60, %v1240_v5 }
 0x3a0   :  { %v1244_v19 = vadd.f32 %v1241_v18, %v1196_v4  ;;  %v1235_v9 = vpop.f32.mrf.mxu2 }
 0x3a1   :  { %v1236_v23 = vadd.f32 %v1643_v60, %v1235_v9 }
 0x3a2   :  { %v1246_v29 = vmax.f32 %v1244_v19, 0.0 }
 0x3a3   :  { %v1243_v16 = vadd.f32 %v1236_v23, %v1195_v13 }
 0x3a4   :  { %v1269_v27 = vrot.slane %v1246_v29, 6 }
 0x3a5   :  { %v1245_v62 = vmax.f32 %v1243_v16, 0.0 }
 0x3a7   :  { %v1268_v31 = vrot.slane %v1245_v62, 7 }
 0x3a8   :  { %v1238_v32 = vpop.f32.mrf.mxu2 }
 0x3a9   :  { %v1271_v17 = vsel %vm1270_vm6, %v1269_v27, %v1268_v31 }
 0x3aa   :  { %1289 = vmatmul.f32.vlgmr.msrb.gmra.mxu1 %v1271_v17 }
 0x427   :  { %v1290_v34 = vpop.f32.mrf.mxu1 }
 0x428   :  { %v1291_v35 = vadd.f32 %v1644_v33, %v1290_v34 }
 0x42a   :  { %1293 = vst [vmem:[%s3042_s4] sm:$0x3] %v1291_v35 }

</bundles_post_ra>
